<compile_context>
chip_gen: v7x
topology: tpu7x:2x2x1
jax: 0.10.0
libtpu: 0.0.40
codegen_flags: <defaults>
</compile_context>

<pallas_src>
import functools

import jax
import jax.numpy as jnp
from jax.experimental import pallas as pl
from jax.experimental.pallas import tpu as pltpu


# ----------------------------------------------------------------------------
# Fused kernel: both branches + folded BN + stride + concat + channel shuffle
# ----------------------------------------------------------------------------
def _inverted_residual_kernel(*refs, benchmodel, stride, spatial, n_batch):
    hh, ww, dd = spatial
    p = hh * ww * dd
    po = p if stride == 1 else ((hh + 1) // 2) * ((ww + 1) // 2) * ((dd + 1) // 2)

    it = iter(refs)
    x_ref = next(it)
    coord_ref = next(it)
    if benchmodel == 2:
        wdw1_ref, bdw1_ref, wp1_ref, bp1_ref = next(it), next(it), next(it), next(it)
    w1_ref, b1_ref = next(it), next(it)
    wdw2_ref, bdw2_ref = next(it), next(it)
    w2_ref, b2_ref = next(it), next(it)
    sel_ref = next(it) if stride == 2 else None
    o_ref = next(it)

    x = x_ref[...].astype(jnp.float32)                       # [N*Ci, P]

    # 3x3x3 halo masks from the [3, P] lane-coordinate table: only the 1-3
    # non-trivial boundary compares per tap (hoisted; reused by both branches).
    hidx = coord_ref[0:1, :]
    widx = coord_ref[1:2, :]
    didx = coord_ref[2:3, :]

    taps = []                                                # (tap_idx, roll_shift, mask[1,P])
    tap = 0
    for oh in (-1, 0, 1):
        for ow in (-1, 0, 1):
            for od in (-1, 0, 1):
                if (oh, ow, od) != (0, 0, 0):
                    conds = []
                    if oh == -1:
                        conds.append(hidx >= 1)
                    elif oh == 1:
                        conds.append(hidx < hh - 1)
                    if ow == -1:
                        conds.append(widx >= 1)
                    elif ow == 1:
                        conds.append(widx < ww - 1)
                    if od == -1:
                        conds.append(didx >= 1)
                    elif od == 1:
                        conds.append(didx < dd - 1)
                    m = conds[0]
                    for cnd in conds[1:]:
                        m = m & cnd
                    delta = oh * (ww * dd) + ow * dd + od
                    taps.append((tap, (-delta) % p, jnp.where(m, 1.0, 0.0)))
                tap += 1

    def depthwise(y, wdw, bdw):
        # 3x3x3 depthwise conv (stride-1 resolution) + folded BN.  Center tap
        # seeds the accumulator (all-ones mask); the other 26 taps are XLU lane
        # rotations (wrap-around killed by the halo masks) + 2 muls + add.
        acc = y * wdw[:, 13:14]
        for t, shift, mask in taps:
            shifted = pltpu.roll(y, shift, axis=1)
            acc = acc + (shifted * wdw[:, t:t + 1]) * mask
        return acc + bdw

    def pointwise(w, b, z, relu):
        # 1x1x1 conv (+bias, optional ReLU) on channel-major [K, P] data.
        co, ci = w.shape
        if ci <= 8:                      # tiny contraction: VPU broadcast-FMAs
            y = w[:, 0:1] * z[0:1, :]
            for cc in range(1, ci):
                y = y + w[:, cc:cc + 1] * z[cc:cc + 1, :]
        else:                            # larger contraction: MXU, exact f32
            y = jnp.dot(w, z, precision=jax.lax.Precision.HIGHEST,
                        preferred_element_type=jnp.float32)
        y = y + b
        return jnp.maximum(y, 0.0) if relu else y

    def downsample(z):
        # stride-2 spatial pick: one exact (precision=HIGHEST) 0/1-selector dot.
        # TODO(synk): replace with an in-VMEM strided pick at production P.
        if stride == 1:
            return z
        return jnp.dot(z, sel_ref[...], precision=jax.lax.Precision.HIGHEST,
                       preferred_element_type=jnp.float32)

    # ---- branch 2: pw1+BN+ReLU -> dw+BN -> [stride pick] -> pw2+BN+ReLU ----
    y = pointwise(w1_ref[...], b1_ref[...], x, relu=True)
    y = downsample(depthwise(y, wdw2_ref[...], bdw2_ref[...]))
    y2 = pointwise(w2_ref[...], b2_ref[...], y, relu=True)
    o_ref[:, po:2 * po] = y2.astype(o_ref.dtype)             # odd shuffled channels

    # ---- branch 1 ----
    if benchmodel == 2:
        z = downsample(depthwise(x, wdw1_ref[...], bdw1_ref[...]))
        y1 = pointwise(wp1_ref[...], bp1_ref[...], z, relu=True)
        o_ref[:, 0:po] = y1.astype(o_ref.dtype)              # even shuffled channels
    else:
        # Identity pass-through of the first half of the input channels,
        # written straight into the even shuffled channel slots.
        cin = x.shape[0] // n_batch
        k = o_ref.shape[0] // n_batch
        for nb in range(n_batch):
            o_ref[nb * k:(nb + 1) * k, 0:po] = (
                x[nb * cin:nb * cin + k, :].astype(o_ref.dtype))


# ----------------------------------------------------------------------------
# Host-side constants (BN fold, lane coords, stride-2 selector) and wrapper
# ----------------------------------------------------------------------------
def _fold_bn(bn, eps=1e-5):
    gamma, beta, rm, rv = bn
    s = gamma / jnp.sqrt(rv + eps)
    return s, beta - rm * s


def _lane_coords(h, w, d):
    """[3, h*w*d] int32 (h, w, d) coordinate of each flattened lane position."""
    pidx = jnp.arange(h * w * d, dtype=jnp.int32)
    return jnp.stack([pidx // (w * d), (pidx // d) % w, pidx % d])


def _stride2_selector(h, w, d):
    """[h*w*d, Po] 0/1 matrix picking the stride-2 output positions."""
    ho, wo, do = (h + 1) // 2, (w + 1) // 2, (d + 1) // 2
    src = ((2 * jnp.arange(ho))[:, None, None] * (w * d) +
           (2 * jnp.arange(wo))[None, :, None] * d +
           (2 * jnp.arange(do))[None, None, :]).reshape(-1)
    return (jnp.arange(h * w * d)[:, None] == src[None, :]).astype(jnp.float32)


def inverted_residual_forward(x, params, benchmodel, stride):
    """Full InvertedResidual forward (branches + concat + channel shuffle) as one
    pallas_call.  x: [N, C, H, W, D] -> [N, C_out, Ho, Wo, Do]."""
    n, c, h, w, d = x.shape
    assert stride in (1, 2)
    assert not (benchmodel == 1 and stride == 2), "split branch requires stride 1"
    p = h * w * d
    ho, wo, do = ((h + 1) // 2, (w + 1) // 2, (d + 1) // 2) if stride == 2 else (h, w, d)
    po = ho * wo * do

    p2 = params["banch2"]
    cm = p2["w_dw"].shape[0]            # branch-2 mid channels (== oup_inc)
    k = p2["w_pw2"].shape[0]            # per-branch output channels (== oup_inc)

    eye_n = jnp.eye(n, dtype=jnp.float32)
    blockdiag = lambda wm: jnp.kron(eye_n, wm)     # replicate weight per batch element
    tile_rows = lambda a: jnp.tile(a, (n, 1))
    tile_bias = lambda v: jnp.tile(v, n)[:, None]

    # ---- branch-2 params: fold BN, replicate block-diagonally over the batch ----
    s1, c1 = _fold_bn(p2["bn_pw1"])
    w1 = p2["w_pw1"] * s1[:, None]
    if benchmodel == 1:                 # branch 2 reads only the 2nd half of the channels
        w1 = jnp.concatenate([jnp.zeros((cm, c - w1.shape[1]), w1.dtype), w1], axis=1)
    sdw2, cdw2 = _fold_bn(p2["bn_dw"])
    s2, c2 = _fold_bn(p2["bn_pw2"])

    inputs = [x.reshape(n * c, p), _lane_coords(h, w, d)]   # free (row-major) reshape of x
    if benchmodel == 2:
        p1 = params["banch1"]
        sdw1, cdw1 = _fold_bn(p1["bn_dw"])
        sp, cp = _fold_bn(p1["bn_pw"])
        inputs += [tile_rows(p1["w_dw"].reshape(c, 27) * sdw1[:, None]),
                   tile_bias(cdw1),
                   blockdiag(p1["w_pw"] * sp[:, None]),
                   tile_bias(cp)]
    inputs += [blockdiag(w1), tile_bias(c1),
               tile_rows(p2["w_dw"].reshape(cm, 27) * sdw2[:, None]), tile_bias(cdw2),
               blockdiag(p2["w_pw2"] * s2[:, None]), tile_bias(c2)]
    if stride == 2:
        inputs.append(_stride2_selector(h, w, d))

    def _full(a):   # whole-array block: everything is small and batch-merged
        shape = tuple(a.shape)
        nd = a.ndim
        return pl.BlockSpec(shape, lambda i: (0,) * nd)

    kernel = functools.partial(
        _inverted_residual_kernel, benchmodel=benchmodel, stride=stride,
        spatial=(h, w, d), n_batch=n)

    out2d = pl.pallas_call(
        kernel,
        out_shape=jax.ShapeDtypeStruct((n * k, 2 * po), x.dtype),
        grid=(1,),
        in_specs=[_full(a) for a in inputs],
        out_specs=pl.BlockSpec((n * k, 2 * po), lambda i: (0, 0)),
        compiler_params=pltpu.CompilerParams(
            dimension_semantics=("arbitrary",),
            vmem_limit_bytes=32 * 1024 * 1024),
    )(*inputs)

    # [N*k, 2*Po] row-major == [N, k, 2, Po] == [N, 2k, Po]: output channels are already
    # interleaved as (branch1_j, branch2_j) == channel_shuffle(concat, 2).  Free reshape.
    return out2d.reshape(n, 2 * k, ho, wo, do)


# ----------------------------------------------------------------------------
# channel_shuffle (used by the pure-JAX reference only; fused in the kernel path)
# ----------------------------------------------------------------------------
def channel_shuffle(x, groups):
    n, c, h, w, d = x.shape
    x = x.reshape(n, groups, c // groups, h, w, d)
    x = jnp.transpose(x, (0, 2, 1, 3, 4, 5))
    return x.reshape(n, c, h, w, d)


# ----------------------------------------------------------------------------
# Deterministic parameter init (matches nn.Conv3d / nn.BatchNorm3d shapes)
# ----------------------------------------------------------------------------
def init_params(key, inp, oup, benchmodel):
    oup_inc = oup // 2
    ks = iter(jax.random.split(key, 64))

    def conv_w(co, ci):
        return 0.3 * jax.random.normal(next(ks), (co, ci), jnp.float32)

    def dw_w(ch):
        return 0.3 * jax.random.normal(next(ks), (ch, 1, 3, 3, 3), jnp.float32)

    def bn(ch):
        g = 0.5 + jax.random.uniform(next(ks), (ch,), jnp.float32)
        b = 0.1 * jax.random.normal(next(ks), (ch,), jnp.float32)
        rm = 0.1 * jax.random.normal(next(ks), (ch,), jnp.float32)
        rv = 0.5 + jax.random.uniform(next(ks), (ch,), jnp.float32)
        return (g, b, rm, rv)

    params = {}
    in2 = oup_inc if benchmodel == 1 else inp
    params["banch2"] = dict(
        w_pw1=conv_w(oup_inc, in2), bn_pw1=bn(oup_inc),
        w_dw=dw_w(oup_inc), bn_dw=bn(oup_inc),
        w_pw2=conv_w(oup_inc, oup_inc), bn_pw2=bn(oup_inc))
    if benchmodel == 2:
        params["banch1"] = dict(
            w_dw=dw_w(inp), bn_dw=bn(inp),
            w_pw=conv_w(oup_inc, inp), bn_pw=bn(oup_inc))
    return params


# ----------------------------------------------------------------------------
# Pure-JAX reference (lax convolutions, full f32 precision) for verification
# ----------------------------------------------------------------------------
_DN = ("NCHWD", "OIHWD", "NCHWD")
_HI = jax.lax.Precision.HIGHEST


def _ref_conv1x1(x, w):
    return jax.lax.conv_general_dilated(
        x, w[:, :, None, None, None], (1, 1, 1), "VALID",
        dimension_numbers=_DN, precision=_HI)


def _ref_dw(x, w, stride):
    return jax.lax.conv_general_dilated(
        x, w, (stride,) * 3, ((1, 1),) * 3, dimension_numbers=_DN,
        feature_group_count=x.shape[1], precision=_HI)


def _ref_bn(x, bnp, eps=1e-5):
    g, b, rm, rv = bnp
    s = g / jnp.sqrt(rv + eps)
    return x * s[None, :, None, None, None] + (b - rm * s)[None, :, None, None, None]


def _ref_banch2(x, p, stride):
    y = jax.nn.relu(_ref_bn(_ref_conv1x1(x, p["w_pw1"]), p["bn_pw1"]))
    y = _ref_bn(_ref_dw(y, p["w_dw"], stride), p["bn_dw"])
    y = jax.nn.relu(_ref_bn(_ref_conv1x1(y, p["w_pw2"]), p["bn_pw2"]))
    return y


def _ref_banch1(x, p, stride):
    y = _ref_bn(_ref_dw(x, p["w_dw"], stride), p["bn_dw"])
    y = jax.nn.relu(_ref_bn(_ref_conv1x1(y, p["w_pw"]), p["bn_pw"]))
    return y


def reference_forward(x, params, benchmodel, stride):
    if benchmodel == 1:
        c = x.shape[1]
        out = jnp.concatenate(
            [x[:, : c // 2], _ref_banch2(x[:, c // 2:], params["banch2"], stride)],
            axis=1)
    else:
        out = jnp.concatenate(
            [_ref_banch1(x, params["banch1"], stride),
             _ref_banch2(x, params["banch2"], stride)], axis=1)
    return channel_shuffle(out, 2)


# ----------------------------------------------------------------------------
if __name__ == "__main__":
    key = jax.random.PRNGKey(0)
    kx, kp1, kp2 = jax.random.split(key, 3)

    N, C, H, W, D = 2, 4, 8, 8, 8
    x = jax.random.normal(kx, (N, C, H, W, D), jnp.float32)

    # benchmodel=1, stride=1  (identity split branch)
    params1 = init_params(kp1, inp=C, oup=C, benchmodel=1)
    fwd1 = jax.jit(functools.partial(inverted_residual_forward,
                                     benchmodel=1, stride=1))
    out1 = fwd1(x, params1)
    jax.block_until_ready(out1)
    ref1 = reference_forward(x, params1, benchmodel=1, stride=1)
    assert out1.shape == (N, C, H, W, D)
    assert jnp.allclose(out1, ref1, atol=1e-4, rtol=1e-4), "benchmodel=1 mismatch"

    # benchmodel=2, stride=2  (downsampling block, oup = 2*inp)
    params2 = init_params(kp2, inp=C, oup=2 * C, benchmodel=2)
    fwd2 = jax.jit(functools.partial(inverted_residual_forward,
                                     benchmodel=2, stride=2))
    out2 = fwd2(x, params2)
    jax.block_until_ready(out2)
    ref2 = reference_forward(x, params2, benchmodel=2, stride=2)
    assert out2.shape == (N, 2 * C, H // 2, W // 2, D // 2)
    assert jnp.allclose(out2, ref2, atol=1e-4, rtol=1e-4), "benchmodel=2 mismatch"

    print("KERNEL_OK")
</pallas_src>

<mosaic_0001>
module attributes {stable_mosaic.version = 11 : i64} {
  func.func @_inverted_residual_kernel(%arg0: i32, %arg1: memref<8x512xf32, #tpu.memory_space<vmem>>, %arg2: memref<3x512xi32, #tpu.memory_space<vmem>>, %arg3: memref<4x8xf32, #tpu.memory_space<vmem>>, %arg4: memref<4x1xf32, #tpu.memory_space<vmem>>, %arg5: memref<4x27xf32, #tpu.memory_space<vmem>>, %arg6: memref<4x1xf32, #tpu.memory_space<vmem>>, %arg7: memref<4x4xf32, #tpu.memory_space<vmem>>, %arg8: memref<4x1xf32, #tpu.memory_space<vmem>>, %arg9: memref<4x1024xf32, #tpu.memory_space<vmem>>) attributes {dimension_semantics = [#tpu.dimension_semantics<arbitrary>], iteration_bounds = array<i64: 1>, scalar_prefetch = 0 : i64, scratch_operands = 0 : i64, tpu.core_type = #tpu.core_type<tc>, window_params = [{pipeline_mode = #tpu.pipeline_mode<synchronous>, transform_indices = @transform_0, window_bounds = array<i64: 8, 512>}, {pipeline_mode = #tpu.pipeline_mode<synchronous>, transform_indices = @transform_1, window_bounds = array<i64: 3, 512>}, {pipeline_mode = #tpu.pipeline_mode<synchronous>, transform_indices = @transform_2, window_bounds = array<i64: 4, 8>}, {pipeline_mode = #tpu.pipeline_mode<synchronous>, transform_indices = @transform_3, window_bounds = array<i64: 4, 1>}, {pipeline_mode = #tpu.pipeline_mode<synchronous>, transform_indices = @transform_4, window_bounds = array<i64: 4, 27>}, {pipeline_mode = #tpu.pipeline_mode<synchronous>, transform_indices = @transform_5, window_bounds = array<i64: 4, 1>}, {pipeline_mode = #tpu.pipeline_mode<synchronous>, transform_indices = @transform_6, window_bounds = array<i64: 4, 4>}, {pipeline_mode = #tpu.pipeline_mode<synchronous>, transform_indices = @transform_7, window_bounds = array<i64: 4, 1>}, {pipeline_mode = #tpu.pipeline_mode<synchronous>, transform_indices = @transform_8, window_bounds = array<i64: 4, 1024>}]} {
    %c0 = arith.constant 0 : index
    %c0_0 = arith.constant 0 : index
    %0 = vector.load %arg1[%c0, %c0_0] : memref<8x512xf32, #tpu.memory_space<vmem>>, vector<8x512xf32>
    %c0_1 = arith.constant 0 : index
    %c0_2 = arith.constant 0 : index
    %1 = vector.load %arg2[%c0_1, %c0_2] : memref<3x512xi32, #tpu.memory_space<vmem>>, vector<1x512xi32>
    %c1 = arith.constant 1 : index
    %c0_3 = arith.constant 0 : index
    %2 = vector.load %arg2[%c1, %c0_3] : memref<3x512xi32, #tpu.memory_space<vmem>>, vector<1x512xi32>
    %c2 = arith.constant 2 : index
    %c0_4 = arith.constant 0 : index
    %3 = vector.load %arg2[%c2, %c0_4] : memref<3x512xi32, #tpu.memory_space<vmem>>, vector<1x512xi32>
    %c1_i32 = arith.constant 1 : i32
    %4 = vector.broadcast %c1_i32 : i32 to vector<1x512xi32>
    %5 = arith.cmpi sge, %1, %4 : vector<1x512xi32>
    %c1_i32_5 = arith.constant 1 : i32
    %6 = vector.broadcast %c1_i32_5 : i32 to vector<1x512xi32>
    %7 = arith.cmpi sge, %2, %6 : vector<1x512xi32>
    %c1_i32_6 = arith.constant 1 : i32
    %8 = vector.broadcast %c1_i32_6 : i32 to vector<1x512xi32>
    %9 = arith.cmpi sge, %3, %8 : vector<1x512xi32>
    %10 = arith.andi %5, %7 : vector<1x512xi1>
    %11 = arith.andi %10, %9 : vector<1x512xi1>
    %cst = arith.constant 1.000000e+00 : f32
    %cst_7 = arith.constant 0.000000e+00 : f32
    %12 = vector.broadcast %cst : f32 to vector<1x512xf32>
    %13 = vector.broadcast %cst_7 : f32 to vector<1x512xf32>
    %14 = arith.select %11, %12, %13 : vector<1x512xi1>, vector<1x512xf32>
    %c1_i32_8 = arith.constant 1 : i32
    %15 = vector.broadcast %c1_i32_8 : i32 to vector<1x512xi32>
    %16 = arith.cmpi sge, %1, %15 : vector<1x512xi32>
    %c1_i32_9 = arith.constant 1 : i32
    %17 = vector.broadcast %c1_i32_9 : i32 to vector<1x512xi32>
    %18 = arith.cmpi sge, %2, %17 : vector<1x512xi32>
    %19 = arith.andi %16, %18 : vector<1x512xi1>
    %cst_10 = arith.constant 1.000000e+00 : f32
    %cst_11 = arith.constant 0.000000e+00 : f32
    %20 = vector.broadcast %cst_10 : f32 to vector<1x512xf32>
    %21 = vector.broadcast %cst_11 : f32 to vector<1x512xf32>
    %22 = arith.select %19, %20, %21 : vector<1x512xi1>, vector<1x512xf32>
    %c1_i32_12 = arith.constant 1 : i32
    %23 = vector.broadcast %c1_i32_12 : i32 to vector<1x512xi32>
    %24 = arith.cmpi sge, %1, %23 : vector<1x512xi32>
    %c1_i32_13 = arith.constant 1 : i32
    %25 = vector.broadcast %c1_i32_13 : i32 to vector<1x512xi32>
    %26 = arith.cmpi sge, %2, %25 : vector<1x512xi32>
    %c7_i32 = arith.constant 7 : i32
    %27 = vector.broadcast %c7_i32 : i32 to vector<1x512xi32>
    %28 = arith.cmpi slt, %3, %27 : vector<1x512xi32>
    %29 = arith.andi %24, %26 : vector<1x512xi1>
    %30 = arith.andi %29, %28 : vector<1x512xi1>
    %cst_14 = arith.constant 1.000000e+00 : f32
    %cst_15 = arith.constant 0.000000e+00 : f32
    %31 = vector.broadcast %cst_14 : f32 to vector<1x512xf32>
    %32 = vector.broadcast %cst_15 : f32 to vector<1x512xf32>
    %33 = arith.select %30, %31, %32 : vector<1x512xi1>, vector<1x512xf32>
    %c1_i32_16 = arith.constant 1 : i32
    %34 = vector.broadcast %c1_i32_16 : i32 to vector<1x512xi32>
    %35 = arith.cmpi sge, %1, %34 : vector<1x512xi32>
    %c1_i32_17 = arith.constant 1 : i32
    %36 = vector.broadcast %c1_i32_17 : i32 to vector<1x512xi32>
    %37 = arith.cmpi sge, %3, %36 : vector<1x512xi32>
    %38 = arith.andi %35, %37 : vector<1x512xi1>
    %cst_18 = arith.constant 1.000000e+00 : f32
    %cst_19 = arith.constant 0.000000e+00 : f32
    %39 = vector.broadcast %cst_18 : f32 to vector<1x512xf32>
    %40 = vector.broadcast %cst_19 : f32 to vector<1x512xf32>
    %41 = arith.select %38, %39, %40 : vector<1x512xi1>, vector<1x512xf32>
    %c1_i32_20 = arith.constant 1 : i32
    %42 = vector.broadcast %c1_i32_20 : i32 to vector<1x512xi32>
    %43 = arith.cmpi sge, %1, %42 : vector<1x512xi32>
    %cst_21 = arith.constant 1.000000e+00 : f32
    %cst_22 = arith.constant 0.000000e+00 : f32
    %44 = vector.broadcast %cst_21 : f32 to vector<1x512xf32>
    %45 = vector.broadcast %cst_22 : f32 to vector<1x512xf32>
    %46 = arith.select %43, %44, %45 : vector<1x512xi1>, vector<1x512xf32>
    %c1_i32_23 = arith.constant 1 : i32
    %47 = vector.broadcast %c1_i32_23 : i32 to vector<1x512xi32>
    %48 = arith.cmpi sge, %1, %47 : vector<1x512xi32>
    %c7_i32_24 = arith.constant 7 : i32
    %49 = vector.broadcast %c7_i32_24 : i32 to vector<1x512xi32>
    %50 = arith.cmpi slt, %3, %49 : vector<1x512xi32>
    %51 = arith.andi %48, %50 : vector<1x512xi1>
    %cst_25 = arith.constant 1.000000e+00 : f32
    %cst_26 = arith.constant 0.000000e+00 : f32
    %52 = vector.broadcast %cst_25 : f32 to vector<1x512xf32>
    %53 = vector.broadcast %cst_26 : f32 to vector<1x512xf32>
    %54 = arith.select %51, %52, %53 : vector<1x512xi1>, vector<1x512xf32>
    %c1_i32_27 = arith.constant 1 : i32
    %55 = vector.broadcast %c1_i32_27 : i32 to vector<1x512xi32>
    %56 = arith.cmpi sge, %1, %55 : vector<1x512xi32>
    %c7_i32_28 = arith.constant 7 : i32
    %57 = vector.broadcast %c7_i32_28 : i32 to vector<1x512xi32>
    %58 = arith.cmpi slt, %2, %57 : vector<1x512xi32>
    %c1_i32_29 = arith.constant 1 : i32
    %59 = vector.broadcast %c1_i32_29 : i32 to vector<1x512xi32>
    %60 = arith.cmpi sge, %3, %59 : vector<1x512xi32>
    %61 = arith.andi %56, %58 : vector<1x512xi1>
    %62 = arith.andi %61, %60 : vector<1x512xi1>
    %cst_30 = arith.constant 1.000000e+00 : f32
    %cst_31 = arith.constant 0.000000e+00 : f32
    %63 = vector.broadcast %cst_30 : f32 to vector<1x512xf32>
    %64 = vector.broadcast %cst_31 : f32 to vector<1x512xf32>
    %65 = arith.select %62, %63, %64 : vector<1x512xi1>, vector<1x512xf32>
    %c1_i32_32 = arith.constant 1 : i32
    %66 = vector.broadcast %c1_i32_32 : i32 to vector<1x512xi32>
    %67 = arith.cmpi sge, %1, %66 : vector<1x512xi32>
    %c7_i32_33 = arith.constant 7 : i32
    %68 = vector.broadcast %c7_i32_33 : i32 to vector<1x512xi32>
    %69 = arith.cmpi slt, %2, %68 : vector<1x512xi32>
    %70 = arith.andi %67, %69 : vector<1x512xi1>
    %cst_34 = arith.constant 1.000000e+00 : f32
    %cst_35 = arith.constant 0.000000e+00 : f32
    %71 = vector.broadcast %cst_34 : f32 to vector<1x512xf32>
    %72 = vector.broadcast %cst_35 : f32 to vector<1x512xf32>
    %73 = arith.select %70, %71, %72 : vector<1x512xi1>, vector<1x512xf32>
    %c1_i32_36 = arith.constant 1 : i32
    %74 = vector.broadcast %c1_i32_36 : i32 to vector<1x512xi32>
    %75 = arith.cmpi sge, %1, %74 : vector<1x512xi32>
    %c7_i32_37 = arith.constant 7 : i32
    %76 = vector.broadcast %c7_i32_37 : i32 to vector<1x512xi32>
    %77 = arith.cmpi slt, %2, %76 : vector<1x512xi32>
    %c7_i32_38 = arith.constant 7 : i32
    %78 = vector.broadcast %c7_i32_38 : i32 to vector<1x512xi32>
    %79 = arith.cmpi slt, %3, %78 : vector<1x512xi32>
    %80 = arith.andi %75, %77 : vector<1x512xi1>
    %81 = arith.andi %80, %79 : vector<1x512xi1>
    %cst_39 = arith.constant 1.000000e+00 : f32
    %cst_40 = arith.constant 0.000000e+00 : f32
    %82 = vector.broadcast %cst_39 : f32 to vector<1x512xf32>
    %83 = vector.broadcast %cst_40 : f32 to vector<1x512xf32>
    %84 = arith.select %81, %82, %83 : vector<1x512xi1>, vector<1x512xf32>
    %c1_i32_41 = arith.constant 1 : i32
    %85 = vector.broadcast %c1_i32_41 : i32 to vector<1x512xi32>
    %86 = arith.cmpi sge, %2, %85 : vector<1x512xi32>
    %c1_i32_42 = arith.constant 1 : i32
    %87 = vector.broadcast %c1_i32_42 : i32 to vector<1x512xi32>
    %88 = arith.cmpi sge, %3, %87 : vector<1x512xi32>
    %89 = arith.andi %86, %88 : vector<1x512xi1>
    %cst_43 = arith.constant 1.000000e+00 : f32
    %cst_44 = arith.constant 0.000000e+00 : f32
    %90 = vector.broadcast %cst_43 : f32 to vector<1x512xf32>
    %91 = vector.broadcast %cst_44 : f32 to vector<1x512xf32>
    %92 = arith.select %89, %90, %91 : vector<1x512xi1>, vector<1x512xf32>
    %c1_i32_45 = arith.constant 1 : i32
    %93 = vector.broadcast %c1_i32_45 : i32 to vector<1x512xi32>
    %94 = arith.cmpi sge, %2, %93 : vector<1x512xi32>
    %cst_46 = arith.constant 1.000000e+00 : f32
    %cst_47 = arith.constant 0.000000e+00 : f32
    %95 = vector.broadcast %cst_46 : f32 to vector<1x512xf32>
    %96 = vector.broadcast %cst_47 : f32 to vector<1x512xf32>
    %97 = arith.select %94, %95, %96 : vector<1x512xi1>, vector<1x512xf32>
    %c1_i32_48 = arith.constant 1 : i32
    %98 = vector.broadcast %c1_i32_48 : i32 to vector<1x512xi32>
    %99 = arith.cmpi sge, %2, %98 : vector<1x512xi32>
    %c7_i32_49 = arith.constant 7 : i32
    %100 = vector.broadcast %c7_i32_49 : i32 to vector<1x512xi32>
    %101 = arith.cmpi slt, %3, %100 : vector<1x512xi32>
    %102 = arith.andi %99, %101 : vector<1x512xi1>
    %cst_50 = arith.constant 1.000000e+00 : f32
    %cst_51 = arith.constant 0.000000e+00 : f32
    %103 = vector.broadcast %cst_50 : f32 to vector<1x512xf32>
    %104 = vector.broadcast %cst_51 : f32 to vector<1x512xf32>
    %105 = arith.select %102, %103, %104 : vector<1x512xi1>, vector<1x512xf32>
    %c1_i32_52 = arith.constant 1 : i32
    %106 = vector.broadcast %c1_i32_52 : i32 to vector<1x512xi32>
    %107 = arith.cmpi sge, %3, %106 : vector<1x512xi32>
    %cst_53 = arith.constant 1.000000e+00 : f32
    %cst_54 = arith.constant 0.000000e+00 : f32
    %108 = vector.broadcast %cst_53 : f32 to vector<1x512xf32>
    %109 = vector.broadcast %cst_54 : f32 to vector<1x512xf32>
    %110 = arith.select %107, %108, %109 : vector<1x512xi1>, vector<1x512xf32>
    %c7_i32_55 = arith.constant 7 : i32
    %111 = vector.broadcast %c7_i32_55 : i32 to vector<1x512xi32>
    %112 = arith.cmpi slt, %3, %111 : vector<1x512xi32>
    %cst_56 = arith.constant 1.000000e+00 : f32
    %cst_57 = arith.constant 0.000000e+00 : f32
    %113 = vector.broadcast %cst_56 : f32 to vector<1x512xf32>
    %114 = vector.broadcast %cst_57 : f32 to vector<1x512xf32>
    %115 = arith.select %112, %113, %114 : vector<1x512xi1>, vector<1x512xf32>
    %c7_i32_58 = arith.constant 7 : i32
    %116 = vector.broadcast %c7_i32_58 : i32 to vector<1x512xi32>
    %117 = arith.cmpi slt, %2, %116 : vector<1x512xi32>
    %c1_i32_59 = arith.constant 1 : i32
    %118 = vector.broadcast %c1_i32_59 : i32 to vector<1x512xi32>
    %119 = arith.cmpi sge, %3, %118 : vector<1x512xi32>
    %120 = arith.andi %117, %119 : vector<1x512xi1>
    %cst_60 = arith.constant 1.000000e+00 : f32
    %cst_61 = arith.constant 0.000000e+00 : f32
    %121 = vector.broadcast %cst_60 : f32 to vector<1x512xf32>
    %122 = vector.broadcast %cst_61 : f32 to vector<1x512xf32>
    %123 = arith.select %120, %121, %122 : vector<1x512xi1>, vector<1x512xf32>
    %c7_i32_62 = arith.constant 7 : i32
    %124 = vector.broadcast %c7_i32_62 : i32 to vector<1x512xi32>
    %125 = arith.cmpi slt, %2, %124 : vector<1x512xi32>
    %cst_63 = arith.constant 1.000000e+00 : f32
    %cst_64 = arith.constant 0.000000e+00 : f32
    %126 = vector.broadcast %cst_63 : f32 to vector<1x512xf32>
    %127 = vector.broadcast %cst_64 : f32 to vector<1x512xf32>
    %128 = arith.select %125, %126, %127 : vector<1x512xi1>, vector<1x512xf32>
    %c7_i32_65 = arith.constant 7 : i32
    %129 = vector.broadcast %c7_i32_65 : i32 to vector<1x512xi32>
    %130 = arith.cmpi slt, %2, %129 : vector<1x512xi32>
    %c7_i32_66 = arith.constant 7 : i32
    %131 = vector.broadcast %c7_i32_66 : i32 to vector<1x512xi32>
    %132 = arith.cmpi slt, %3, %131 : vector<1x512xi32>
    %133 = arith.andi %130, %132 : vector<1x512xi1>
    %cst_67 = arith.constant 1.000000e+00 : f32
    %cst_68 = arith.constant 0.000000e+00 : f32
    %134 = vector.broadcast %cst_67 : f32 to vector<1x512xf32>
    %135 = vector.broadcast %cst_68 : f32 to vector<1x512xf32>
    %136 = arith.select %133, %134, %135 : vector<1x512xi1>, vector<1x512xf32>
    %c7_i32_69 = arith.constant 7 : i32
    %137 = vector.broadcast %c7_i32_69 : i32 to vector<1x512xi32>
    %138 = arith.cmpi slt, %1, %137 : vector<1x512xi32>
    %c1_i32_70 = arith.constant 1 : i32
    %139 = vector.broadcast %c1_i32_70 : i32 to vector<1x512xi32>
    %140 = arith.cmpi sge, %2, %139 : vector<1x512xi32>
    %c1_i32_71 = arith.constant 1 : i32
    %141 = vector.broadcast %c1_i32_71 : i32 to vector<1x512xi32>
    %142 = arith.cmpi sge, %3, %141 : vector<1x512xi32>
    %143 = arith.andi %138, %140 : vector<1x512xi1>
    %144 = arith.andi %143, %142 : vector<1x512xi1>
    %cst_72 = arith.constant 1.000000e+00 : f32
    %cst_73 = arith.constant 0.000000e+00 : f32
    %145 = vector.broadcast %cst_72 : f32 to vector<1x512xf32>
    %146 = vector.broadcast %cst_73 : f32 to vector<1x512xf32>
    %147 = arith.select %144, %145, %146 : vector<1x512xi1>, vector<1x512xf32>
    %c7_i32_74 = arith.constant 7 : i32
    %148 = vector.broadcast %c7_i32_74 : i32 to vector<1x512xi32>
    %149 = arith.cmpi slt, %1, %148 : vector<1x512xi32>
    %c1_i32_75 = arith.constant 1 : i32
    %150 = vector.broadcast %c1_i32_75 : i32 to vector<1x512xi32>
    %151 = arith.cmpi sge, %2, %150 : vector<1x512xi32>
    %152 = arith.andi %149, %151 : vector<1x512xi1>
    %cst_76 = arith.constant 1.000000e+00 : f32
    %cst_77 = arith.constant 0.000000e+00 : f32
    %153 = vector.broadcast %cst_76 : f32 to vector<1x512xf32>
    %154 = vector.broadcast %cst_77 : f32 to vector<1x512xf32>
    %155 = arith.select %152, %153, %154 : vector<1x512xi1>, vector<1x512xf32>
    %c7_i32_78 = arith.constant 7 : i32
    %156 = vector.broadcast %c7_i32_78 : i32 to vector<1x512xi32>
    %157 = arith.cmpi slt, %1, %156 : vector<1x512xi32>
    %c1_i32_79 = arith.constant 1 : i32
    %158 = vector.broadcast %c1_i32_79 : i32 to vector<1x512xi32>
    %159 = arith.cmpi sge, %2, %158 : vector<1x512xi32>
    %c7_i32_80 = arith.constant 7 : i32
    %160 = vector.broadcast %c7_i32_80 : i32 to vector<1x512xi32>
    %161 = arith.cmpi slt, %3, %160 : vector<1x512xi32>
    %162 = arith.andi %157, %159 : vector<1x512xi1>
    %163 = arith.andi %162, %161 : vector<1x512xi1>
    %cst_81 = arith.constant 1.000000e+00 : f32
    %cst_82 = arith.constant 0.000000e+00 : f32
    %164 = vector.broadcast %cst_81 : f32 to vector<1x512xf32>
    %165 = vector.broadcast %cst_82 : f32 to vector<1x512xf32>
    %166 = arith.select %163, %164, %165 : vector<1x512xi1>, vector<1x512xf32>
    %c7_i32_83 = arith.constant 7 : i32
    %167 = vector.broadcast %c7_i32_83 : i32 to vector<1x512xi32>
    %168 = arith.cmpi slt, %1, %167 : vector<1x512xi32>
    %c1_i32_84 = arith.constant 1 : i32
    %169 = vector.broadcast %c1_i32_84 : i32 to vector<1x512xi32>
    %170 = arith.cmpi sge, %3, %169 : vector<1x512xi32>
    %171 = arith.andi %168, %170 : vector<1x512xi1>
    %cst_85 = arith.constant 1.000000e+00 : f32
    %cst_86 = arith.constant 0.000000e+00 : f32
    %172 = vector.broadcast %cst_85 : f32 to vector<1x512xf32>
    %173 = vector.broadcast %cst_86 : f32 to vector<1x512xf32>
    %174 = arith.select %171, %172, %173 : vector<1x512xi1>, vector<1x512xf32>
    %c7_i32_87 = arith.constant 7 : i32
    %175 = vector.broadcast %c7_i32_87 : i32 to vector<1x512xi32>
    %176 = arith.cmpi slt, %1, %175 : vector<1x512xi32>
    %cst_88 = arith.constant 1.000000e+00 : f32
    %cst_89 = arith.constant 0.000000e+00 : f32
    %177 = vector.broadcast %cst_88 : f32 to vector<1x512xf32>
    %178 = vector.broadcast %cst_89 : f32 to vector<1x512xf32>
    %179 = arith.select %176, %177, %178 : vector<1x512xi1>, vector<1x512xf32>
    %c7_i32_90 = arith.constant 7 : i32
    %180 = vector.broadcast %c7_i32_90 : i32 to vector<1x512xi32>
    %181 = arith.cmpi slt, %1, %180 : vector<1x512xi32>
    %c7_i32_91 = arith.constant 7 : i32
    %182 = vector.broadcast %c7_i32_91 : i32 to vector<1x512xi32>
    %183 = arith.cmpi slt, %3, %182 : vector<1x512xi32>
    %184 = arith.andi %181, %183 : vector<1x512xi1>
    %cst_92 = arith.constant 1.000000e+00 : f32
    %cst_93 = arith.constant 0.000000e+00 : f32
    %185 = vector.broadcast %cst_92 : f32 to vector<1x512xf32>
    %186 = vector.broadcast %cst_93 : f32 to vector<1x512xf32>
    %187 = arith.select %184, %185, %186 : vector<1x512xi1>, vector<1x512xf32>
    %c7_i32_94 = arith.constant 7 : i32
    %188 = vector.broadcast %c7_i32_94 : i32 to vector<1x512xi32>
    %189 = arith.cmpi slt, %1, %188 : vector<1x512xi32>
    %c7_i32_95 = arith.constant 7 : i32
    %190 = vector.broadcast %c7_i32_95 : i32 to vector<1x512xi32>
    %191 = arith.cmpi slt, %2, %190 : vector<1x512xi32>
    %c1_i32_96 = arith.constant 1 : i32
    %192 = vector.broadcast %c1_i32_96 : i32 to vector<1x512xi32>
    %193 = arith.cmpi sge, %3, %192 : vector<1x512xi32>
    %194 = arith.andi %189, %191 : vector<1x512xi1>
    %195 = arith.andi %194, %193 : vector<1x512xi1>
    %cst_97 = arith.constant 1.000000e+00 : f32
    %cst_98 = arith.constant 0.000000e+00 : f32
    %196 = vector.broadcast %cst_97 : f32 to vector<1x512xf32>
    %197 = vector.broadcast %cst_98 : f32 to vector<1x512xf32>
    %198 = arith.select %195, %196, %197 : vector<1x512xi1>, vector<1x512xf32>
    %c7_i32_99 = arith.constant 7 : i32
    %199 = vector.broadcast %c7_i32_99 : i32 to vector<1x512xi32>
    %200 = arith.cmpi slt, %1, %199 : vector<1x512xi32>
    %c7_i32_100 = arith.constant 7 : i32
    %201 = vector.broadcast %c7_i32_100 : i32 to vector<1x512xi32>
    %202 = arith.cmpi slt, %2, %201 : vector<1x512xi32>
    %203 = arith.andi %200, %202 : vector<1x512xi1>
    %cst_101 = arith.constant 1.000000e+00 : f32
    %cst_102 = arith.constant 0.000000e+00 : f32
    %204 = vector.broadcast %cst_101 : f32 to vector<1x512xf32>
    %205 = vector.broadcast %cst_102 : f32 to vector<1x512xf32>
    %206 = arith.select %203, %204, %205 : vector<1x512xi1>, vector<1x512xf32>
    %c7_i32_103 = arith.constant 7 : i32
    %207 = vector.broadcast %c7_i32_103 : i32 to vector<1x512xi32>
    %208 = arith.cmpi slt, %1, %207 : vector<1x512xi32>
    %c7_i32_104 = arith.constant 7 : i32
    %209 = vector.broadcast %c7_i32_104 : i32 to vector<1x512xi32>
    %210 = arith.cmpi slt, %2, %209 : vector<1x512xi32>
    %c7_i32_105 = arith.constant 7 : i32
    %211 = vector.broadcast %c7_i32_105 : i32 to vector<1x512xi32>
    %212 = arith.cmpi slt, %3, %211 : vector<1x512xi32>
    %213 = arith.andi %208, %210 : vector<1x512xi1>
    %214 = arith.andi %213, %212 : vector<1x512xi1>
    %cst_106 = arith.constant 1.000000e+00 : f32
    %cst_107 = arith.constant 0.000000e+00 : f32
    %215 = vector.broadcast %cst_106 : f32 to vector<1x512xf32>
    %216 = vector.broadcast %cst_107 : f32 to vector<1x512xf32>
    %217 = arith.select %214, %215, %216 : vector<1x512xi1>, vector<1x512xf32>
    %c0_108 = arith.constant 0 : index
    %c0_109 = arith.constant 0 : index
    %218 = vector.load %arg3[%c0_108, %c0_109] : memref<4x8xf32, #tpu.memory_space<vmem>>, vector<4x8xf32>
    %c0_110 = arith.constant 0 : index
    %c0_111 = arith.constant 0 : index
    %219 = vector.load %arg4[%c0_110, %c0_111] : memref<4x1xf32, #tpu.memory_space<vmem>>, vector<4x1xf32>
    %220 = vector.extract_strided_slice %218 {offsets = [0, 0], sizes = [4, 1], strides = [1, 1]} : vector<4x8xf32> to vector<4x1xf32>
    %221 = vector.extract_strided_slice %0 {offsets = [0, 0], sizes = [1, 512], strides = [1, 1]} : vector<8x512xf32> to vector<1x512xf32>
    %222 = vector.broadcast %220 : vector<4x1xf32> to vector<4x512xf32>
    %223 = vector.broadcast %221 : vector<1x512xf32> to vector<4x512xf32>
    %224 = arith.mulf %222, %223 : vector<4x512xf32>
    %225 = vector.extract_strided_slice %218 {offsets = [0, 1], sizes = [4, 1], strides = [1, 1]} : vector<4x8xf32> to vector<4x1xf32>
    %226 = vector.extract_strided_slice %0 {offsets = [1, 0], sizes = [1, 512], strides = [1, 1]} : vector<8x512xf32> to vector<1x512xf32>
    %227 = vector.broadcast %225 : vector<4x1xf32> to vector<4x512xf32>
    %228 = vector.broadcast %226 : vector<1x512xf32> to vector<4x512xf32>
    %229 = arith.mulf %227, %228 : vector<4x512xf32>
    %230 = arith.addf %224, %229 : vector<4x512xf32>
    %231 = vector.extract_strided_slice %218 {offsets = [0, 2], sizes = [4, 1], strides = [1, 1]} : vector<4x8xf32> to vector<4x1xf32>
    %232 = vector.extract_strided_slice %0 {offsets = [2, 0], sizes = [1, 512], strides = [1, 1]} : vector<8x512xf32> to vector<1x512xf32>
    %233 = vector.broadcast %231 : vector<4x1xf32> to vector<4x512xf32>
    %234 = vector.broadcast %232 : vector<1x512xf32> to vector<4x512xf32>
    %235 = arith.mulf %233, %234 : vector<4x512xf32>
    %236 = arith.addf %230, %235 : vector<4x512xf32>
    %237 = vector.extract_strided_slice %218 {offsets = [0, 3], sizes = [4, 1], strides = [1, 1]} : vector<4x8xf32> to vector<4x1xf32>
    %238 = vector.extract_strided_slice %0 {offsets = [3, 0], sizes = [1, 512], strides = [1, 1]} : vector<8x512xf32> to vector<1x512xf32>
    %239 = vector.broadcast %237 : vector<4x1xf32> to vector<4x512xf32>
    %240 = vector.broadcast %238 : vector<1x512xf32> to vector<4x512xf32>
    %241 = arith.mulf %239, %240 : vector<4x512xf32>
    %242 = arith.addf %236, %241 : vector<4x512xf32>
    %243 = vector.extract_strided_slice %218 {offsets = [0, 4], sizes = [4, 1], strides = [1, 1]} : vector<4x8xf32> to vector<4x1xf32>
    %244 = vector.extract_strided_slice %0 {offsets = [4, 0], sizes = [1, 512], strides = [1, 1]} : vector<8x512xf32> to vector<1x512xf32>
    %245 = vector.broadcast %243 : vector<4x1xf32> to vector<4x512xf32>
    %246 = vector.broadcast %244 : vector<1x512xf32> to vector<4x512xf32>
    %247 = arith.mulf %245, %246 : vector<4x512xf32>
    %248 = arith.addf %242, %247 : vector<4x512xf32>
    %249 = vector.extract_strided_slice %218 {offsets = [0, 5], sizes = [4, 1], strides = [1, 1]} : vector<4x8xf32> to vector<4x1xf32>
    %250 = vector.extract_strided_slice %0 {offsets = [5, 0], sizes = [1, 512], strides = [1, 1]} : vector<8x512xf32> to vector<1x512xf32>
    %251 = vector.broadcast %249 : vector<4x1xf32> to vector<4x512xf32>
    %252 = vector.broadcast %250 : vector<1x512xf32> to vector<4x512xf32>
    %253 = arith.mulf %251, %252 : vector<4x512xf32>
    %254 = arith.addf %248, %253 : vector<4x512xf32>
    %255 = vector.extract_strided_slice %218 {offsets = [0, 6], sizes = [4, 1], strides = [1, 1]} : vector<4x8xf32> to vector<4x1xf32>
    %256 = vector.extract_strided_slice %0 {offsets = [6, 0], sizes = [1, 512], strides = [1, 1]} : vector<8x512xf32> to vector<1x512xf32>
    %257 = vector.broadcast %255 : vector<4x1xf32> to vector<4x512xf32>
    %258 = vector.broadcast %256 : vector<1x512xf32> to vector<4x512xf32>
    %259 = arith.mulf %257, %258 : vector<4x512xf32>
    %260 = arith.addf %254, %259 : vector<4x512xf32>
    %261 = vector.extract_strided_slice %218 {offsets = [0, 7], sizes = [4, 1], strides = [1, 1]} : vector<4x8xf32> to vector<4x1xf32>
    %262 = vector.extract_strided_slice %0 {offsets = [7, 0], sizes = [1, 512], strides = [1, 1]} : vector<8x512xf32> to vector<1x512xf32>
    %263 = vector.broadcast %261 : vector<4x1xf32> to vector<4x512xf32>
    %264 = vector.broadcast %262 : vector<1x512xf32> to vector<4x512xf32>
    %265 = arith.mulf %263, %264 : vector<4x512xf32>
    %266 = arith.addf %260, %265 : vector<4x512xf32>
    %267 = vector.broadcast %219 : vector<4x1xf32> to vector<4x512xf32>
    %268 = arith.addf %266, %267 : vector<4x512xf32>
    %cst_112 = arith.constant 0.000000e+00 : f32
    %269 = vector.broadcast %cst_112 : f32 to vector<4x512xf32>
    %270 = arith.maximumf %268, %269 : vector<4x512xf32>
    %c0_113 = arith.constant 0 : index
    %c0_114 = arith.constant 0 : index
    %271 = vector.load %arg5[%c0_113, %c0_114] : memref<4x27xf32, #tpu.memory_space<vmem>>, vector<4x27xf32>
    %c0_115 = arith.constant 0 : index
    %c0_116 = arith.constant 0 : index
    %272 = vector.load %arg6[%c0_115, %c0_116] : memref<4x1xf32, #tpu.memory_space<vmem>>, vector<4x1xf32>
    %273 = vector.extract_strided_slice %271 {offsets = [0, 13], sizes = [4, 1], strides = [1, 1]} : vector<4x27xf32> to vector<4x1xf32>
    %274 = vector.broadcast %273 : vector<4x1xf32> to vector<4x512xf32>
    %275 = arith.mulf %270, %274 : vector<4x512xf32>
    %c73_i32 = arith.constant 73 : i32
    %276 = tpu.dynamic_rotate %270 by %c73_i32 dim 1 : vector<4x512xf32>, i32 -> vector<4x512xf32>
    %277 = vector.extract_strided_slice %271 {offsets = [0, 0], sizes = [4, 1], strides = [1, 1]} : vector<4x27xf32> to vector<4x1xf32>
    %278 = vector.broadcast %277 : vector<4x1xf32> to vector<4x512xf32>
    %279 = arith.mulf %276, %278 : vector<4x512xf32>
    %280 = vector.broadcast %14 : vector<1x512xf32> to vector<4x512xf32>
    %281 = arith.mulf %279, %280 : vector<4x512xf32>
    %282 = arith.addf %275, %281 : vector<4x512xf32>
    %c72_i32 = arith.constant 72 : i32
    %283 = tpu.dynamic_rotate %270 by %c72_i32 dim 1 : vector<4x512xf32>, i32 -> vector<4x512xf32>
    %284 = vector.extract_strided_slice %271 {offsets = [0, 1], sizes = [4, 1], strides = [1, 1]} : vector<4x27xf32> to vector<4x1xf32>
    %285 = vector.broadcast %284 : vector<4x1xf32> to vector<4x512xf32>
    %286 = arith.mulf %283, %285 : vector<4x512xf32>
    %287 = vector.broadcast %22 : vector<1x512xf32> to vector<4x512xf32>
    %288 = arith.mulf %286, %287 : vector<4x512xf32>
    %289 = arith.addf %282, %288 : vector<4x512xf32>
    %c71_i32 = arith.constant 71 : i32
    %290 = tpu.dynamic_rotate %270 by %c71_i32 dim 1 : vector<4x512xf32>, i32 -> vector<4x512xf32>
    %291 = vector.extract_strided_slice %271 {offsets = [0, 2], sizes = [4, 1], strides = [1, 1]} : vector<4x27xf32> to vector<4x1xf32>
    %292 = vector.broadcast %291 : vector<4x1xf32> to vector<4x512xf32>
    %293 = arith.mulf %290, %292 : vector<4x512xf32>
    %294 = vector.broadcast %33 : vector<1x512xf32> to vector<4x512xf32>
    %295 = arith.mulf %293, %294 : vector<4x512xf32>
    %296 = arith.addf %289, %295 : vector<4x512xf32>
    %c65_i32 = arith.constant 65 : i32
    %297 = tpu.dynamic_rotate %270 by %c65_i32 dim 1 : vector<4x512xf32>, i32 -> vector<4x512xf32>
    %298 = vector.extract_strided_slice %271 {offsets = [0, 3], sizes = [4, 1], strides = [1, 1]} : vector<4x27xf32> to vector<4x1xf32>
    %299 = vector.broadcast %298 : vector<4x1xf32> to vector<4x512xf32>
    %300 = arith.mulf %297, %299 : vector<4x512xf32>
    %301 = vector.broadcast %41 : vector<1x512xf32> to vector<4x512xf32>
    %302 = arith.mulf %300, %301 : vector<4x512xf32>
    %303 = arith.addf %296, %302 : vector<4x512xf32>
    %c64_i32 = arith.constant 64 : i32
    %304 = tpu.dynamic_rotate %270 by %c64_i32 dim 1 : vector<4x512xf32>, i32 -> vector<4x512xf32>
    %305 = vector.extract_strided_slice %271 {offsets = [0, 4], sizes = [4, 1], strides = [1, 1]} : vector<4x27xf32> to vector<4x1xf32>
    %306 = vector.broadcast %305 : vector<4x1xf32> to vector<4x512xf32>
    %307 = arith.mulf %304, %306 : vector<4x512xf32>
    %308 = vector.broadcast %46 : vector<1x512xf32> to vector<4x512xf32>
    %309 = arith.mulf %307, %308 : vector<4x512xf32>
    %310 = arith.addf %303, %309 : vector<4x512xf32>
    %c63_i32 = arith.constant 63 : i32
    %311 = tpu.dynamic_rotate %270 by %c63_i32 dim 1 : vector<4x512xf32>, i32 -> vector<4x512xf32>
    %312 = vector.extract_strided_slice %271 {offsets = [0, 5], sizes = [4, 1], strides = [1, 1]} : vector<4x27xf32> to vector<4x1xf32>
    %313 = vector.broadcast %312 : vector<4x1xf32> to vector<4x512xf32>
    %314 = arith.mulf %311, %313 : vector<4x512xf32>
    %315 = vector.broadcast %54 : vector<1x512xf32> to vector<4x512xf32>
    %316 = arith.mulf %314, %315 : vector<4x512xf32>
    %317 = arith.addf %310, %316 : vector<4x512xf32>
    %c57_i32 = arith.constant 57 : i32
    %318 = tpu.dynamic_rotate %270 by %c57_i32 dim 1 : vector<4x512xf32>, i32 -> vector<4x512xf32>
    %319 = vector.extract_strided_slice %271 {offsets = [0, 6], sizes = [4, 1], strides = [1, 1]} : vector<4x27xf32> to vector<4x1xf32>
    %320 = vector.broadcast %319 : vector<4x1xf32> to vector<4x512xf32>
    %321 = arith.mulf %318, %320 : vector<4x512xf32>
    %322 = vector.broadcast %65 : vector<1x512xf32> to vector<4x512xf32>
    %323 = arith.mulf %321, %322 : vector<4x512xf32>
    %324 = arith.addf %317, %323 : vector<4x512xf32>
    %c56_i32 = arith.constant 56 : i32
    %325 = tpu.dynamic_rotate %270 by %c56_i32 dim 1 : vector<4x512xf32>, i32 -> vector<4x512xf32>
    %326 = vector.extract_strided_slice %271 {offsets = [0, 7], sizes = [4, 1], strides = [1, 1]} : vector<4x27xf32> to vector<4x1xf32>
    %327 = vector.broadcast %326 : vector<4x1xf32> to vector<4x512xf32>
    %328 = arith.mulf %325, %327 : vector<4x512xf32>
    %329 = vector.broadcast %73 : vector<1x512xf32> to vector<4x512xf32>
    %330 = arith.mulf %328, %329 : vector<4x512xf32>
    %331 = arith.addf %324, %330 : vector<4x512xf32>
    %c55_i32 = arith.constant 55 : i32
    %332 = tpu.dynamic_rotate %270 by %c55_i32 dim 1 : vector<4x512xf32>, i32 -> vector<4x512xf32>
    %333 = vector.extract_strided_slice %271 {offsets = [0, 8], sizes = [4, 1], strides = [1, 1]} : vector<4x27xf32> to vector<4x1xf32>
    %334 = vector.broadcast %333 : vector<4x1xf32> to vector<4x512xf32>
    %335 = arith.mulf %332, %334 : vector<4x512xf32>
    %336 = vector.broadcast %84 : vector<1x512xf32> to vector<4x512xf32>
    %337 = arith.mulf %335, %336 : vector<4x512xf32>
    %338 = arith.addf %331, %337 : vector<4x512xf32>
    %c9_i32 = arith.constant 9 : i32
    %339 = tpu.dynamic_rotate %270 by %c9_i32 dim 1 : vector<4x512xf32>, i32 -> vector<4x512xf32>
    %340 = vector.extract_strided_slice %271 {offsets = [0, 9], sizes = [4, 1], strides = [1, 1]} : vector<4x27xf32> to vector<4x1xf32>
    %341 = vector.broadcast %340 : vector<4x1xf32> to vector<4x512xf32>
    %342 = arith.mulf %339, %341 : vector<4x512xf32>
    %343 = vector.broadcast %92 : vector<1x512xf32> to vector<4x512xf32>
    %344 = arith.mulf %342, %343 : vector<4x512xf32>
    %345 = arith.addf %338, %344 : vector<4x512xf32>
    %c8_i32 = arith.constant 8 : i32
    %346 = tpu.dynamic_rotate %270 by %c8_i32 dim 1 : vector<4x512xf32>, i32 -> vector<4x512xf32>
    %347 = vector.extract_strided_slice %271 {offsets = [0, 10], sizes = [4, 1], strides = [1, 1]} : vector<4x27xf32> to vector<4x1xf32>
    %348 = vector.broadcast %347 : vector<4x1xf32> to vector<4x512xf32>
    %349 = arith.mulf %346, %348 : vector<4x512xf32>
    %350 = vector.broadcast %97 : vector<1x512xf32> to vector<4x512xf32>
    %351 = arith.mulf %349, %350 : vector<4x512xf32>
    %352 = arith.addf %345, %351 : vector<4x512xf32>
    %c7_i32_117 = arith.constant 7 : i32
    %353 = tpu.dynamic_rotate %270 by %c7_i32_117 dim 1 : vector<4x512xf32>, i32 -> vector<4x512xf32>
    %354 = vector.extract_strided_slice %271 {offsets = [0, 11], sizes = [4, 1], strides = [1, 1]} : vector<4x27xf32> to vector<4x1xf32>
    %355 = vector.broadcast %354 : vector<4x1xf32> to vector<4x512xf32>
    %356 = arith.mulf %353, %355 : vector<4x512xf32>
    %357 = vector.broadcast %105 : vector<1x512xf32> to vector<4x512xf32>
    %358 = arith.mulf %356, %357 : vector<4x512xf32>
    %359 = arith.addf %352, %358 : vector<4x512xf32>
    %c1_i32_118 = arith.constant 1 : i32
    %360 = tpu.dynamic_rotate %270 by %c1_i32_118 dim 1 : vector<4x512xf32>, i32 -> vector<4x512xf32>
    %361 = vector.extract_strided_slice %271 {offsets = [0, 12], sizes = [4, 1], strides = [1, 1]} : vector<4x27xf32> to vector<4x1xf32>
    %362 = vector.broadcast %361 : vector<4x1xf32> to vector<4x512xf32>
    %363 = arith.mulf %360, %362 : vector<4x512xf32>
    %364 = vector.broadcast %110 : vector<1x512xf32> to vector<4x512xf32>
    %365 = arith.mulf %363, %364 : vector<4x512xf32>
    %366 = arith.addf %359, %365 : vector<4x512xf32>
    %c511_i32 = arith.constant 511 : i32
    %367 = tpu.dynamic_rotate %270 by %c511_i32 dim 1 : vector<4x512xf32>, i32 -> vector<4x512xf32>
    %368 = vector.extract_strided_slice %271 {offsets = [0, 14], sizes = [4, 1], strides = [1, 1]} : vector<4x27xf32> to vector<4x1xf32>
    %369 = vector.broadcast %368 : vector<4x1xf32> to vector<4x512xf32>
    %370 = arith.mulf %367, %369 : vector<4x512xf32>
    %371 = vector.broadcast %115 : vector<1x512xf32> to vector<4x512xf32>
    %372 = arith.mulf %370, %371 : vector<4x512xf32>
    %373 = arith.addf %366, %372 : vector<4x512xf32>
    %c505_i32 = arith.constant 505 : i32
    %374 = tpu.dynamic_rotate %270 by %c505_i32 dim 1 : vector<4x512xf32>, i32 -> vector<4x512xf32>
    %375 = vector.extract_strided_slice %271 {offsets = [0, 15], sizes = [4, 1], strides = [1, 1]} : vector<4x27xf32> to vector<4x1xf32>
    %376 = vector.broadcast %375 : vector<4x1xf32> to vector<4x512xf32>
    %377 = arith.mulf %374, %376 : vector<4x512xf32>
    %378 = vector.broadcast %123 : vector<1x512xf32> to vector<4x512xf32>
    %379 = arith.mulf %377, %378 : vector<4x512xf32>
    %380 = arith.addf %373, %379 : vector<4x512xf32>
    %c504_i32 = arith.constant 504 : i32
    %381 = tpu.dynamic_rotate %270 by %c504_i32 dim 1 : vector<4x512xf32>, i32 -> vector<4x512xf32>
    %382 = vector.extract_strided_slice %271 {offsets = [0, 16], sizes = [4, 1], strides = [1, 1]} : vector<4x27xf32> to vector<4x1xf32>
    %383 = vector.broadcast %382 : vector<4x1xf32> to vector<4x512xf32>
    %384 = arith.mulf %381, %383 : vector<4x512xf32>
    %385 = vector.broadcast %128 : vector<1x512xf32> to vector<4x512xf32>
    %386 = arith.mulf %384, %385 : vector<4x512xf32>
    %387 = arith.addf %380, %386 : vector<4x512xf32>
    %c503_i32 = arith.constant 503 : i32
    %388 = tpu.dynamic_rotate %270 by %c503_i32 dim 1 : vector<4x512xf32>, i32 -> vector<4x512xf32>
    %389 = vector.extract_strided_slice %271 {offsets = [0, 17], sizes = [4, 1], strides = [1, 1]} : vector<4x27xf32> to vector<4x1xf32>
    %390 = vector.broadcast %389 : vector<4x1xf32> to vector<4x512xf32>
    %391 = arith.mulf %388, %390 : vector<4x512xf32>
    %392 = vector.broadcast %136 : vector<1x512xf32> to vector<4x512xf32>
    %393 = arith.mulf %391, %392 : vector<4x512xf32>
    %394 = arith.addf %387, %393 : vector<4x512xf32>
    %c457_i32 = arith.constant 457 : i32
    %395 = tpu.dynamic_rotate %270 by %c457_i32 dim 1 : vector<4x512xf32>, i32 -> vector<4x512xf32>
    %396 = vector.extract_strided_slice %271 {offsets = [0, 18], sizes = [4, 1], strides = [1, 1]} : vector<4x27xf32> to vector<4x1xf32>
    %397 = vector.broadcast %396 : vector<4x1xf32> to vector<4x512xf32>
    %398 = arith.mulf %395, %397 : vector<4x512xf32>
    %399 = vector.broadcast %147 : vector<1x512xf32> to vector<4x512xf32>
    %400 = arith.mulf %398, %399 : vector<4x512xf32>
    %401 = arith.addf %394, %400 : vector<4x512xf32>
    %c456_i32 = arith.constant 456 : i32
    %402 = tpu.dynamic_rotate %270 by %c456_i32 dim 1 : vector<4x512xf32>, i32 -> vector<4x512xf32>
    %403 = vector.extract_strided_slice %271 {offsets = [0, 19], sizes = [4, 1], strides = [1, 1]} : vector<4x27xf32> to vector<4x1xf32>
    %404 = vector.broadcast %403 : vector<4x1xf32> to vector<4x512xf32>
    %405 = arith.mulf %402, %404 : vector<4x512xf32>
    %406 = vector.broadcast %155 : vector<1x512xf32> to vector<4x512xf32>
    %407 = arith.mulf %405, %406 : vector<4x512xf32>
    %408 = arith.addf %401, %407 : vector<4x512xf32>
    %c455_i32 = arith.constant 455 : i32
    %409 = tpu.dynamic_rotate %270 by %c455_i32 dim 1 : vector<4x512xf32>, i32 -> vector<4x512xf32>
    %410 = vector.extract_strided_slice %271 {offsets = [0, 20], sizes = [4, 1], strides = [1, 1]} : vector<4x27xf32> to vector<4x1xf32>
    %411 = vector.broadcast %410 : vector<4x1xf32> to vector<4x512xf32>
    %412 = arith.mulf %409, %411 : vector<4x512xf32>
    %413 = vector.broadcast %166 : vector<1x512xf32> to vector<4x512xf32>
    %414 = arith.mulf %412, %413 : vector<4x512xf32>
    %415 = arith.addf %408, %414 : vector<4x512xf32>
    %c449_i32 = arith.constant 449 : i32
    %416 = tpu.dynamic_rotate %270 by %c449_i32 dim 1 : vector<4x512xf32>, i32 -> vector<4x512xf32>
    %417 = vector.extract_strided_slice %271 {offsets = [0, 21], sizes = [4, 1], strides = [1, 1]} : vector<4x27xf32> to vector<4x1xf32>
    %418 = vector.broadcast %417 : vector<4x1xf32> to vector<4x512xf32>
    %419 = arith.mulf %416, %418 : vector<4x512xf32>
    %420 = vector.broadcast %174 : vector<1x512xf32> to vector<4x512xf32>
    %421 = arith.mulf %419, %420 : vector<4x512xf32>
    %422 = arith.addf %415, %421 : vector<4x512xf32>
    %c448_i32 = arith.constant 448 : i32
    %423 = tpu.dynamic_rotate %270 by %c448_i32 dim 1 : vector<4x512xf32>, i32 -> vector<4x512xf32>
    %424 = vector.extract_strided_slice %271 {offsets = [0, 22], sizes = [4, 1], strides = [1, 1]} : vector<4x27xf32> to vector<4x1xf32>
    %425 = vector.broadcast %424 : vector<4x1xf32> to vector<4x512xf32>
    %426 = arith.mulf %423, %425 : vector<4x512xf32>
    %427 = vector.broadcast %179 : vector<1x512xf32> to vector<4x512xf32>
    %428 = arith.mulf %426, %427 : vector<4x512xf32>
    %429 = arith.addf %422, %428 : vector<4x512xf32>
    %c447_i32 = arith.constant 447 : i32
    %430 = tpu.dynamic_rotate %270 by %c447_i32 dim 1 : vector<4x512xf32>, i32 -> vector<4x512xf32>
    %431 = vector.extract_strided_slice %271 {offsets = [0, 23], sizes = [4, 1], strides = [1, 1]} : vector<4x27xf32> to vector<4x1xf32>
    %432 = vector.broadcast %431 : vector<4x1xf32> to vector<4x512xf32>
    %433 = arith.mulf %430, %432 : vector<4x512xf32>
    %434 = vector.broadcast %187 : vector<1x512xf32> to vector<4x512xf32>
    %435 = arith.mulf %433, %434 : vector<4x512xf32>
    %436 = arith.addf %429, %435 : vector<4x512xf32>
    %c441_i32 = arith.constant 441 : i32
    %437 = tpu.dynamic_rotate %270 by %c441_i32 dim 1 : vector<4x512xf32>, i32 -> vector<4x512xf32>
    %438 = vector.extract_strided_slice %271 {offsets = [0, 24], sizes = [4, 1], strides = [1, 1]} : vector<4x27xf32> to vector<4x1xf32>
    %439 = vector.broadcast %438 : vector<4x1xf32> to vector<4x512xf32>
    %440 = arith.mulf %437, %439 : vector<4x512xf32>
    %441 = vector.broadcast %198 : vector<1x512xf32> to vector<4x512xf32>
    %442 = arith.mulf %440, %441 : vector<4x512xf32>
    %443 = arith.addf %436, %442 : vector<4x512xf32>
    %c440_i32 = arith.constant 440 : i32
    %444 = tpu.dynamic_rotate %270 by %c440_i32 dim 1 : vector<4x512xf32>, i32 -> vector<4x512xf32>
    %445 = vector.extract_strided_slice %271 {offsets = [0, 25], sizes = [4, 1], strides = [1, 1]} : vector<4x27xf32> to vector<4x1xf32>
    %446 = vector.broadcast %445 : vector<4x1xf32> to vector<4x512xf32>
    %447 = arith.mulf %444, %446 : vector<4x512xf32>
    %448 = vector.broadcast %206 : vector<1x512xf32> to vector<4x512xf32>
    %449 = arith.mulf %447, %448 : vector<4x512xf32>
    %450 = arith.addf %443, %449 : vector<4x512xf32>
    %c439_i32 = arith.constant 439 : i32
    %451 = tpu.dynamic_rotate %270 by %c439_i32 dim 1 : vector<4x512xf32>, i32 -> vector<4x512xf32>
    %452 = vector.extract_strided_slice %271 {offsets = [0, 26], sizes = [4, 1], strides = [1, 1]} : vector<4x27xf32> to vector<4x1xf32>
    %453 = vector.broadcast %452 : vector<4x1xf32> to vector<4x512xf32>
    %454 = arith.mulf %451, %453 : vector<4x512xf32>
    %455 = vector.broadcast %217 : vector<1x512xf32> to vector<4x512xf32>
    %456 = arith.mulf %454, %455 : vector<4x512xf32>
    %457 = arith.addf %450, %456 : vector<4x512xf32>
    %458 = vector.broadcast %272 : vector<4x1xf32> to vector<4x512xf32>
    %459 = arith.addf %457, %458 : vector<4x512xf32>
    %c0_119 = arith.constant 0 : index
    %c0_120 = arith.constant 0 : index
    %460 = vector.load %arg7[%c0_119, %c0_120] : memref<4x4xf32, #tpu.memory_space<vmem>>, vector<4x4xf32>
    %c0_121 = arith.constant 0 : index
    %c0_122 = arith.constant 0 : index
    %461 = vector.load %arg8[%c0_121, %c0_122] : memref<4x1xf32, #tpu.memory_space<vmem>>, vector<4x1xf32>
    %462 = vector.extract_strided_slice %460 {offsets = [0, 0], sizes = [4, 1], strides = [1, 1]} : vector<4x4xf32> to vector<4x1xf32>
    %463 = vector.extract_strided_slice %459 {offsets = [0, 0], sizes = [1, 512], strides = [1, 1]} : vector<4x512xf32> to vector<1x512xf32>
    %464 = vector.broadcast %462 : vector<4x1xf32> to vector<4x512xf32>
    %465 = vector.broadcast %463 : vector<1x512xf32> to vector<4x512xf32>
    %466 = arith.mulf %464, %465 : vector<4x512xf32>
    %467 = vector.extract_strided_slice %460 {offsets = [0, 1], sizes = [4, 1], strides = [1, 1]} : vector<4x4xf32> to vector<4x1xf32>
    %468 = vector.extract_strided_slice %459 {offsets = [1, 0], sizes = [1, 512], strides = [1, 1]} : vector<4x512xf32> to vector<1x512xf32>
    %469 = vector.broadcast %467 : vector<4x1xf32> to vector<4x512xf32>
    %470 = vector.broadcast %468 : vector<1x512xf32> to vector<4x512xf32>
    %471 = arith.mulf %469, %470 : vector<4x512xf32>
    %472 = arith.addf %466, %471 : vector<4x512xf32>
    %473 = vector.extract_strided_slice %460 {offsets = [0, 2], sizes = [4, 1], strides = [1, 1]} : vector<4x4xf32> to vector<4x1xf32>
    %474 = vector.extract_strided_slice %459 {offsets = [2, 0], sizes = [1, 512], strides = [1, 1]} : vector<4x512xf32> to vector<1x512xf32>
    %475 = vector.broadcast %473 : vector<4x1xf32> to vector<4x512xf32>
    %476 = vector.broadcast %474 : vector<1x512xf32> to vector<4x512xf32>
    %477 = arith.mulf %475, %476 : vector<4x512xf32>
    %478 = arith.addf %472, %477 : vector<4x512xf32>
    %479 = vector.extract_strided_slice %460 {offsets = [0, 3], sizes = [4, 1], strides = [1, 1]} : vector<4x4xf32> to vector<4x1xf32>
    %480 = vector.extract_strided_slice %459 {offsets = [3, 0], sizes = [1, 512], strides = [1, 1]} : vector<4x512xf32> to vector<1x512xf32>
    %481 = vector.broadcast %479 : vector<4x1xf32> to vector<4x512xf32>
    %482 = vector.broadcast %480 : vector<1x512xf32> to vector<4x512xf32>
    %483 = arith.mulf %481, %482 : vector<4x512xf32>
    %484 = arith.addf %478, %483 : vector<4x512xf32>
    %485 = vector.broadcast %461 : vector<4x1xf32> to vector<4x512xf32>
    %486 = arith.addf %484, %485 : vector<4x512xf32>
    %cst_123 = arith.constant 0.000000e+00 : f32
    %487 = vector.broadcast %cst_123 : f32 to vector<4x512xf32>
    %488 = arith.maximumf %486, %487 : vector<4x512xf32>
    %c0_124 = arith.constant 0 : index
    %c512 = arith.constant 512 : index
    %489 = vector.load %arg9[%c0_124, %c512] : memref<4x1024xf32, #tpu.memory_space<vmem>>, vector<4x512xf32>
    tpu.vector_store %arg9[%c0_124, %c512], %488 {strides = array<i32>} : memref<4x1024xf32, #tpu.memory_space<vmem>>, vector<4x512xf32>,
    %490 = vector.extract_strided_slice %0 {offsets = [0, 0], sizes = [2, 512], strides = [1, 1]} : vector<8x512xf32> to vector<2x512xf32>
    %c0_125 = arith.constant 0 : index
    %c0_126 = arith.constant 0 : index
    %491 = vector.load %arg9[%c0_125, %c0_126] : memref<4x1024xf32, #tpu.memory_space<vmem>>, vector<2x512xf32>
    tpu.vector_store %arg9[%c0_125, %c0_126], %490 {strides = array<i32>} : memref<4x1024xf32, #tpu.memory_space<vmem>>, vector<2x512xf32>,
    %492 = vector.extract_strided_slice %0 {offsets = [4, 0], sizes = [2, 512], strides = [1, 1]} : vector<8x512xf32> to vector<2x512xf32>
    %c2_127 = arith.constant 2 : index
    %c0_128 = arith.constant 0 : index
    %493 = vector.load %arg9[%c2_127, %c0_128] : memref<4x1024xf32, #tpu.memory_space<vmem>>, vector<2x512xf32>
    tpu.vector_store %arg9[%c2_127, %c0_128], %492 {strides = array<i32>} : memref<4x1024xf32, #tpu.memory_space<vmem>>, vector<2x512xf32>,
    return
  }
  func.func @transform_0(%arg0: i32) -> (i32, i32) {
    %c0_i32 = arith.constant 0 : i32
    %c0_i32_0 = arith.constant 0 : i32
    %c0_i32_1 = arith.constant 0 : i32
    return %c0_i32, %c0_i32_0 : i32, i32
  }
  func.func @transform_1(%arg0: i32) -> (i32, i32) {
    %c0_i32 = arith.constant 0 : i32
    %c0_i32_0 = arith.constant 0 : i32
    %c0_i32_1 = arith.constant 0 : i32
    return %c0_i32, %c0_i32_0 : i32, i32
  }
  func.func @transform_2(%arg0: i32) -> (i32, i32) {
    %c0_i32 = arith.constant 0 : i32
    %c0_i32_0 = arith.constant 0 : i32
    %c0_i32_1 = arith.constant 0 : i32
    return %c0_i32, %c0_i32_0 : i32, i32
  }
  func.func @transform_3(%arg0: i32) -> (i32, i32) {
    %c0_i32 = arith.constant 0 : i32
    %c0_i32_0 = arith.constant 0 : i32
    %c0_i32_1 = arith.constant 0 : i32
    return %c0_i32, %c0_i32_0 : i32, i32
  }
  func.func @transform_4(%arg0: i32) -> (i32, i32) {
    %c0_i32 = arith.constant 0 : i32
    %c0_i32_0 = arith.constant 0 : i32
    %c0_i32_1 = arith.constant 0 : i32
    return %c0_i32, %c0_i32_0 : i32, i32
  }
  func.func @transform_5(%arg0: i32) -> (i32, i32) {
    %c0_i32 = arith.constant 0 : i32
    %c0_i32_0 = arith.constant 0 : i32
    %c0_i32_1 = arith.constant 0 : i32
    return %c0_i32, %c0_i32_0 : i32, i32
  }
  func.func @transform_6(%arg0: i32) -> (i32, i32) {
    %c0_i32 = arith.constant 0 : i32
    %c0_i32_0 = arith.constant 0 : i32
    %c0_i32_1 = arith.constant 0 : i32
    return %c0_i32, %c0_i32_0 : i32, i32
  }
  func.func @transform_7(%arg0: i32) -> (i32, i32) {
    %c0_i32 = arith.constant 0 : i32
    %c0_i32_0 = arith.constant 0 : i32
    %c0_i32_1 = arith.constant 0 : i32
    return %c0_i32, %c0_i32_0 : i32, i32
  }
  func.func @transform_8(%arg0: i32) -> (i32, i32) {
    %c0_i32 = arith.constant 0 : i32
    %c0_i32_0 = arith.constant 0 : i32
    %c0_i32_1 = arith.constant 0 : i32
    return %c0_i32, %c0_i32_0 : i32, i32
  }
}

</mosaic_0001>

<bundles_post_ra>
// kernel: tile.33
= control target key start
LH: loop header
LB: loop body
LE: loop exit
PB: predicated region body
PF: predicated region fallthrough
CT: control target
= control target key end

     0   :  { %s22_s0 = inlined_call_operand.vmem [shape: f32[2], index: 0, kind: input, shape index: {}]   ;;  %s23_s1 = inlined_call_operand.vmem [shape: f32[2,2], index: 1, kind: output, shape index: {}]  }
   0x1   :  { %v4_v0 = vld [vmem:[%s22_s0] ss:$0 sm:$0xff] }
   0x2   :  { %5 = vst [vmem:[%s23_s1] sm:$0x3] %v4_v0 }

// kernel: tile.1
= control target key start
LH: loop header
LB: loop body
LE: loop exit
PB: predicated region body
PF: predicated region fallthrough
CT: control target
= control target key end

     0   :  { %vm7_vm0 = vcmask 7168   ;;  %s39_s0 = inlined_call_operand.vmem [shape: f32[2,2], index: 0, kind: input, shape index: {}]   ;;  %s40_s1 = inlined_call_operand.vmem [shape: f32[4,1], index: 1, kind: output, shape index: {}]  }
   0x1   :  { %v4_v0 = vld [vmem:[%s39_s0] sm:$0x3]  ;;  %s22_s0 = smov 127  }
   0x2   :  { %5 = vst [vmem:[#allocation1] sm:$0x3] %v4_v0 }
   0x9   :  { %v9_v1 = vld [vmem:[#allocation1] sm:$0x3]  }
   0xa   :  { %v6_v2 = vld [vmem:[#allocation1] sm:$0x3]   ;;  %10 = vrot.lane.b32.xlu0 %v9_v1, %s22_s0 }
   0xb   :  { %8 = vst.msk [vmem:[#allocation0] ss:$2 sm:$0x3] %vm7_vm0, %v6_v2  }
  0x7c   :  { %v11_v3 = vpop.permute.xlu0 %10  }
  0x7d   :  { %14 = vst.msk [vmem:[#allocation0 + $0x1] ss:$2 sm:$0x3] %vm7_vm0, %v11_v3  }
  0x84   :  { %v18_v4 = vld [vmem:[#allocation0] sm:$0xf] }
  0x85   :  { %20 = vst [vmem:[%s40_s1] sm:$0xf] %v18_v4 }

// kernel: inverted_residual_forward.1
= control target key start
LH: loop header
LB: loop body
LE: loop exit
PB: predicated region body
PF: predicated region fallthrough
CT: control target
= control target key end

     0   :  { %v3351_v0 = vmov 0   ;;  %v3350_v2 = vmov 2   ;;  %v3349_v4 = vmov 3   ;;  %v1784_v5 = vmov 1   ;;  %s1793_s17 = smov 73   ;;  %s1794_s18 = smov 72   ;;  %s3340_s2 = inlined_call_operand.vmem [shape: f32[4,8], index: 2, kind: input, shape index: {}]   ;;  %s3341_s3 = inlined_call_operand.vmem [shape: f32[4,1], index: 3, kind: input, shape index: {}]   ;;  %s3342_s4 = inlined_call_operand.vmem [shape: f32[4,27], index: 4, kind: input, shape index: {}]   ;;  %s3343_s0 = inlined_call_operand.vmem [shape: f32[8,512], index: 0, kind: input, shape index: {}]   ;;  %s3344_s6 = inlined_call_operand.vmem [shape: f32[4,4], index: 6, kind: input, shape index: {}]   ;;  %s3345_s7 = inlined_call_operand.vmem [shape: f32[4,1], index: 7, kind: input, shape index: {}]   ;;  %s3346_s1 = inlined_call_operand.vmem [shape: s32[3,512], index: 1, kind: input, shape index: {}]   ;;  %s3347_s5 = inlined_call_operand.vmem [shape: f32[4,1], index: 5, kind: input, shape index: {}]   ;;  %s3348_s8 = inlined_call_operand.vmem [shape: f32[4,1024], index: 8, kind: output, shape index: {}]  }
   0x1   :  { %1734 = vset.pattern.permute.xlu0 %v3351_v0  ;;  %v90_v1 = vld [vmem:[%s3340_s2] sm:$0xf]  ;;  %1735 = vset.pattern.permute.xlu1 %v3350_v2  ;;  %v1785_v6 = vmov 4   ;;  %v1786_v8 = vmov 6   ;;  %v1787_v9 = vmov 7   ;;  %v1788_v10 = vmov 13  }
   0x2   :  { %94 = vperm.xlu0 %1734, %v90_v1   ;;  %146 = vperm.xlu1 %1735, %v90_v1   ;;  %v91_v3 = vld [vmem:[%s3341_s3] sm:$0xf]  ;;  %v1789_v11 = vmov 5   ;;  %v1790_v12 = vmov 8   ;;  %v1791_v13 = vmov 9   ;;  %v1792_v14 = vmov 10  }
   0x3   :  { %v1884_v7 = vld [vmem:[%s3342_s4] sm:$0xf]  ;;  %v97_v16 = vlaneseq  ;;  %v1922_v25 = vld [vmem:[%s3343_s0 + $0x8] sm:$0xff]  ;;  %v1927_v26 = vld [vmem:[%s3343_s0 + $0x10] sm:$0xff]  ;;  %s1795_s19 = smov 71   ;;  %s1797_s20 = smov 65  }
   0x4   :  { %v1914_v23 = vld [vmem:[%s3343_s0] sm:$0xff]  ;;  %v1932_v27 = vld [vmem:[%s3343_s0 + $0x18] sm:$0xff]  ;;  %s1798_s21 = smov 64   ;;  %s1799_s22 = smov 63  }
   0x5   :  { %v1903_v18 = vshrl.u32 %v97_v16, 7  ;;  %s1800_s23 = smov 57   ;;  %s1801_s24 = smov 56  }
   0x6   :  { %315 = vperm.xlu0 %1734, %v91_v3   ;;  %1736 = vset.pattern.permute.xlu1 %v3349_v4  ;;  %s1802_s25 = smov 55   ;;  %s1803_s26 = smov 9  }
   0x7   :  { %174 = vperm.xlu1 %1736, %v90_v1   ;;  %v1906_v19 = vsub.s32 1, %v1903_v18  ;;  %v1909_v21 = vsub.s32 0, %v1903_v18  ;;  %v1917_v24 = vsub.s32 2, %v1903_v18  ;;  %v1935_v28 = vsub.s32 3, %v1903_v18  ;;  %s1804_s27 = smov 8   ;;  %s1805_s28 = smov 7  }
   0x8   :  { %v207_v51 = vsub.s32 4, %v1903_v18  ;;  %s1807_s29 = smov 1   ;;  %s1810_s30 = smov 127  }
   0x9   :  { %v124_v29 = vrot.slane %v1914_v23, %v1906_v19  ;;  %v128_v30 = vrot.slane %v1922_v25, %v1906_v19  ;;  %v132_v31 = vrot.slane %v1927_v26, %v1906_v19  ;;  %v136_v32 = vrot.slane %v1932_v27, %v1906_v19  ;;  %s1812_s2 = smov 121   ;;  %s1814_s9 = smov 120  }
   0xa   :  { %1740 = vset.pattern.permute.xlu0 %v1784_v5  ;;  %v100_v34 = vrot.slane %v1914_v23, %v1909_v21  ;;  %v104_v35 = vrot.slane %v1922_v25, %v1909_v21  ;;  %v108_v36 = vrot.slane %v1927_v26, %v1909_v21  ;;  %v112_v37 = vrot.slane %v1932_v27, %v1909_v21  ;;  %s1816_s3 = smov 119  }
   0xb   :  { %118 = vperm.xlu0 %1740, %v90_v1   ;;  %1737 = vset.pattern.permute.xlu1 %v1785_v6  ;;  %v152_v38 = vrot.slane %v1914_v23, %v1917_v24  ;;  %v156_v39 = vrot.slane %v1922_v25, %v1917_v24  ;;  %v160_v40 = vrot.slane %v1927_v26, %v1917_v24 }
   0xc   :  { %202 = vperm.xlu1 %1737, %v90_v1   ;;  %v164_v41 = vrot.slane %v1932_v27, %v1917_v24  ;;  %v180_v43 = vrot.slane %v1914_v23, %v1935_v28  ;;  %v184_v48 = vrot.slane %v1922_v25, %v1935_v28  ;;  %v188_v49 = vrot.slane %v1927_v26, %v1935_v28 }
   0xd   :  { %v192_v50 = vrot.slane %v1932_v27, %v1935_v28 }
   0xf   :  { %403 = vperm.xlu0 %1740, %v1884_v7  }
  0x10   :  { %1738 = vset.pattern.permute.xlu1 %v1786_v8 }
  0x11   :  { %258 = vperm.xlu1 %1738, %v90_v1  }
  0x13   :  { %1743 = vset.pattern.permute.xlu0 %v3350_v2 }
  0x14   :  { %453 = vperm.xlu0 %1743, %v1884_v7  }
  0x15   :  { %1739 = vset.pattern.permute.xlu1 %v1787_v9 }
  0x16   :  { %286 = vperm.xlu1 %1739, %v90_v1  }
  0x18   :  { %1744 = vset.pattern.permute.xlu0 %v3349_v4 }
  0x19   :  { %503 = vperm.xlu0 %1744, %v1884_v7  }
  0x1a   :  { %1741 = vset.pattern.permute.xlu1 %v1788_v10  ;;  %v220_v10 = vrot.slane %v1932_v27, %v207_v51 }
  0x1b   :  { %330 = vperm.xlu1 %1741, %v1884_v7  }
  0x1d   :  { %1745 = vset.pattern.permute.xlu0 %v1785_v6  ;;  %v208_v6 = vrot.slane %v1914_v23, %v207_v51 }
  0x1e   :  { %553 = vperm.xlu0 %1745, %v1884_v7  }
  0x1f   :  { %1742 = vset.pattern.permute.xlu1 %v3351_v0 }
  0x20   :  { %353 = vperm.xlu1 %1742, %v1884_v7  }
  0x22   :  { %1746 = vset.pattern.permute.xlu0 %v1789_v11 }
  0x23   :  { %230 = vperm.xlu0 %1746, %v90_v1  }
  0x27   :  { %603 = vperm.xlu0 %1746, %v1884_v7  }
  0x2b   :  { %1747 = vset.pattern.permute.xlu0 %v1786_v8  ;;  %v212_v8 = vrot.slane %v1922_v25, %v207_v51 }
  0x2c   :  { %653 = vperm.xlu0 %1747, %v1884_v7  }
  0x30   :  { %1748 = vset.pattern.permute.xlu0 %v1787_v9  ;;  %v216_v9 = vrot.slane %v1927_v26, %v207_v51 }
  0x31   :  { %703 = vperm.xlu0 %1748, %v1884_v7  }
  0x35   :  { %1749 = vset.pattern.permute.xlu0 %v1790_v12  ;;  %v263_v12 = vsub.s32 6, %v1903_v18 }
  0x36   :  { %753 = vperm.xlu0 %1749, %v1884_v7  }
  0x3a   :  { %1750 = vset.pattern.permute.xlu0 %v1791_v13 }
  0x3b   :  { %803 = vperm.xlu0 %1750, %v1884_v7  }
  0x3f   :  { %1751 = vset.pattern.permute.xlu0 %v1792_v14 }
  0x81   :  { %v95_v15 = vpop.permute.xlu0 %94  ;;  %v147_v22 = vpop.permute.xlu1 %146 }
  0x82   :  { %v113_v53 = vmul.f32 %v100_v34, %v95_v15  ;;  %v114_v54 = vmul.f32 %v104_v35, %v95_v15  ;;  %v115_v55 = vmul.f32 %v108_v36, %v95_v15  ;;  %v116_v56 = vmul.f32 %v112_v37, %v95_v15 }
  0x83   :  { %v165_v57 = vmul.f32 %v152_v38, %v147_v22  ;;  %v166_v58 = vmul.f32 %v156_v39, %v147_v22  ;;  %v167_v59 = vmul.f32 %v160_v40, %v147_v22  ;;  %v168_v60 = vmul.f32 %v164_v41, %v147_v22 }
  0x84   :  { %v235_v34 = vsub.s32 5, %v1903_v18  ;;  %v264_v35 = vrot.slane %v1914_v23, %v263_v12  ;;  %v268_v36 = vrot.slane %v1922_v25, %v263_v12  ;;  %v272_v37 = vrot.slane %v1927_v26, %v263_v12 }
  0x85   :  { %v1900_v17 = vpop.permute.xlu0 %315  ;;  %v291_v38 = vsub.s32 7, %v1903_v18  ;;  %v276_v18 = vrot.slane %v1932_v27, %v263_v12 }
  0x86   :  { %v175_v42 = vpop.permute.xlu1 %174  ;;  %v248_v51 = vrot.slane %v1932_v27, %v235_v34 }
  0x87   :  { %v193_v13 = vmul.f32 %v180_v43, %v175_v42  ;;  %v194_v14 = vmul.f32 %v184_v48, %v175_v42  ;;  %v195_v15 = vmul.f32 %v188_v49, %v175_v42  ;;  %v236_v48 = vrot.slane %v1914_v23, %v235_v34 }
  0x88   :  { %v240_v49 = vrot.slane %v1922_v25, %v235_v34 }
  0x8a   :  { %v119_v20 = vpop.permute.xlu0 %118 }
  0x8b   :  { %v137_v44 = vmul.f32 %v124_v29, %v119_v20  ;;  %v138_v45 = vmul.f32 %v128_v30, %v119_v20  ;;  %v139_v46 = vmul.f32 %v132_v31, %v119_v20  ;;  %v140_v47 = vmul.f32 %v136_v32, %v119_v20  ;;  %v203_v3 = vpop.permute.xlu1 %202 }
  0x8c   :  { %v196_v20 = vmul.f32 %v192_v50, %v175_v42  ;;  %v221_v39 = vmul.f32 %v208_v6, %v203_v3  ;;  %v222_v40 = vmul.f32 %v212_v8, %v203_v3  ;;  %v223_v41 = vmul.f32 %v216_v9, %v203_v3 }
  0x8d   :  { %v141_v61 = vadd.f32 %v137_v44, %v113_v53  ;;  %v142_v62 = vadd.f32 %v138_v45, %v114_v54  ;;  %v143_v63 = vadd.f32 %v139_v46, %v115_v55  ;;  %v144_v1 = vadd.f32 %v140_v47, %v116_v56 }
  0x8e   :  { %v1945_v33 = vpop.permute.xlu0 %403  ;;  %v224_v43 = vmul.f32 %v220_v10, %v203_v3  ;;  %v244_v50 = vrot.slane %v1927_v26, %v235_v34  ;;  %v292_v53 = vrot.slane %v1914_v23, %v291_v38  ;;  %v296_v54 = vrot.slane %v1922_v25, %v291_v38 }
  0x8f   :  { %v169_v22 = vadd.f32 %v165_v57, %v141_v61  ;;  %v170_v29 = vadd.f32 %v166_v58, %v142_v62  ;;  %v171_v30 = vadd.f32 %v167_v59, %v143_v63  ;;  %v172_v31 = vadd.f32 %v168_v60, %v144_v1 }
  0x90   :  { %v259_v32 = vpop.permute.xlu1 %258  ;;  %v304_v55 = vrot.slane %v1932_v27, %v291_v38  ;;  %v300_v60 = vrot.slane %v1927_v26, %v291_v38 }
  0x91   :  { %v197_v44 = vadd.f32 %v193_v13, %v169_v22  ;;  %v198_v45 = vadd.f32 %v194_v14, %v170_v29  ;;  %v199_v46 = vadd.f32 %v195_v15, %v171_v30  ;;  %v200_v47 = vadd.f32 %v196_v20, %v172_v31 }
  0x92   :  { %v277_v56 = vmul.f32 %v264_v35, %v259_v32  ;;  %v278_v57 = vmul.f32 %v268_v36, %v259_v32  ;;  %v279_v58 = vmul.f32 %v272_v37, %v259_v32  ;;  %v280_v23 = vmul.f32 %v276_v18, %v259_v32 }
  0x93   :  { %v1972_v52 = vpop.permute.xlu0 %453  ;;  %v225_v62 = vadd.f32 %v221_v39, %v197_v44  ;;  %v226_v63 = vadd.f32 %v222_v40, %v198_v45  ;;  %v227_v1 = vadd.f32 %v223_v41, %v199_v46  ;;  %v228_v3 = vadd.f32 %v224_v43, %v200_v47 }
  0x94   :  { %v1806_v46 = vmov 11   ;;  %v1808_v47 = vmov 14   ;;  %v1815_v18 = vmov 19  }
  0x95   :  { %v287_v59 = vpop.permute.xlu1 %286 }
  0x96   :  { %v305_v12 = vmul.f32 %v292_v53, %v287_v59  ;;  %v306_v25 = vmul.f32 %v296_v54, %v287_v59  ;;  %v308_v13 = vmul.f32 %v304_v55, %v287_v59  ;;  %v307_v22 = vmul.f32 %v300_v60, %v287_v59 }
  0x97   :  { %v1817_v55 = vmov 20  }
  0x98   :  { %v1978_v11 = vpop.permute.xlu0 %503 }
  0x9d   :  { %v1986_v42 = vpop.permute.xlu0 %553 }
  0xa2   :  { %v231_v61 = vpop.permute.xlu0 %230 }
  0xa3   :  { %v249_v6 = vmul.f32 %v236_v48, %v231_v61  ;;  %v250_v8 = vmul.f32 %v240_v49, %v231_v61  ;;  %v251_v9 = vmul.f32 %v244_v50, %v231_v61  ;;  %v252_v10 = vmul.f32 %v248_v51, %v231_v61 }
  0xa4   :  { %v1809_v48 = vmov 16   ;;  %v1811_v49 = vmov 17   ;;  %v1813_v50 = vmov 18   ;;  %v1819_v61 = vmov 26  }
  0xa5   :  { %v253_v27 = vadd.f32 %v249_v6, %v225_v62  ;;  %v254_v14 = vadd.f32 %v250_v8, %v226_v63  ;;  %v255_v15 = vadd.f32 %v251_v9, %v227_v1  ;;  %v256_v20 = vadd.f32 %v252_v10, %v228_v3  ;;  %v2114_v1 = vld [vmem:[%s3344_s6] sm:$0xf] }
  0xa6   :  { %v2071_v51 = vpop.permute.xlu0 %603  ;;  %v1532_v6 = vld [vmem:[%s3345_s7] sm:$0xf] }
  0xa7   :  { %v281_v29 = vadd.f32 %v277_v56, %v253_v27  ;;  %v282_v26 = vadd.f32 %v278_v57, %v254_v14  ;;  %v283_v30 = vadd.f32 %v279_v58, %v255_v15  ;;  %v284_v31 = vadd.f32 %v280_v23, %v256_v20  ;;  %v2088_v56 = vpop.permute.xlu1 %330  ;;  %v2128_v9 = vld [vmem:[%s3346_s1] ss:$4 sm:$0xf]  ;;  %v2141_v23 = vld [vmem:[%s3346_s1 + $0x2] ss:$4 sm:$0xf] }
  0xa8   :  { %v1818_v58 = vmov 23   ;;  %vm38_vm0 = vcmp.ge.s32.totalorder %v2128_v9, 1  ;;  %vm40_vm2 = vcmp.ge.s32.totalorder %v2141_v23, 1  ;;  %vm45_vm5 = vcmp.lt.s32.totalorder %v2141_v23, 7 }
  0xa9   :  { %v309_v34 = vadd.f32 %v305_v12, %v281_v29  ;;  %v310_v35 = vadd.f32 %v306_v25, %v282_v26  ;;  %v312_v36 = vadd.f32 %v308_v13, %v284_v31  ;;  %v311_v37 = vadd.f32 %v307_v22, %v283_v30  ;;  %vm48_vm9 = vmand %vm38_vm0, %vm40_vm2 }
  0xaa   :  { %v2164_v27 = vand.u32 127, %v97_v16  ;;  %v3352_v15 = vmov 0.0   ;;  %vm51_vm13 = vmand %vm38_vm0, %vm45_vm5 }
  0xab   :  { %v318_v38 = vadd.f32 %v1900_v17, %v309_v34  ;;  %v319_v32 = vadd.f32 %v1900_v17, %v310_v35  ;;  %v321_v39 = vadd.f32 %v1900_v17, %v312_v36  ;;  %v320_v43 = vadd.f32 %v1900_v17, %v311_v37  ;;  %v2077_v53 = vpop.permute.xlu0 %653  ;;  %v2097_v59 = vpop.permute.xlu1 %353 }
  0xac   :  { %v1796_v17 = vmov 12   ;;  %vm347_vm7 = vcmp.lt.s32.totalorder %v2164_v27, 73  ;;  %vm397_vm8 = vcmp.lt.s32.totalorder %v2164_v27, 72  ;;  %vm447_vm10 = vcmp.lt.s32.totalorder %v2164_v27, 71 }
  0xad   :  { %v2000_v40 = vmax.f32 %v318_v38, 0.0  ;;  %v2002_v41 = vmax.f32 %v319_v32, 0.0  ;;  %v2007_v44 = vmax.f32 %v321_v39, 0.0  ;;  %v2009_v45 = vmax.f32 %v320_v43, 0.0  ;;  %1753 = vset.pattern.permute.xlu1 %v1796_v17 }
  0xae   :  { %vm497_vm11 = vcmp.lt.s32.totalorder %v2164_v27, 65  ;;  %vm547_vm12 = vcmp.lt.s32.totalorder %v2164_v27, 64  ;;  %vm597_vm14 = vcmp.lt.s32.totalorder %v2164_v27, 63 }
  0xaf   :  { %339 = vrot.lane.b32.xlu0 %v2002_v41, %s1793_s17  ;;  %337 = vrot.lane.b32.xlu1 %v2000_v40, %s1793_s17  ;;  %v2195_v37 = vmul.f32 %v2088_v56, %v2000_v40  ;;  %v2199_v38 = vmul.f32 %v2088_v56, %v2002_v41  ;;  %v2203_v32 = vmul.f32 %v2088_v56, %v2009_v45 }
  0xb0   :  { %v2086_v54 = vpop.permute.xlu0 %703  ;;  %v2207_v39 = vmul.f32 %v2088_v56, %v2007_v44 }
  0xb3   :  { %343 = vrot.lane.b32.xlu0 %v2007_v44, %s1793_s17  ;;  %341 = vrot.lane.b32.xlu1 %v2009_v45, %s1793_s17 }
  0xb5   :  { %v2093_v57 = vpop.permute.xlu0 %753 }
  0xb7   :  { %389 = vrot.lane.b32.xlu0 %v2000_v40, %s1794_s18  ;;  %391 = vrot.lane.b32.xlu1 %v2002_v41, %s1794_s18 }
  0xba   :  { %v2102_v60 = vpop.permute.xlu0 %803 }
  0xbb   :  { %393 = vrot.lane.b32.xlu0 %v2009_v45, %s1794_s18  ;;  %395 = vrot.lane.b32.xlu1 %v2007_v44, %s1794_s18 }
  0xbf   :  { %443 = vrot.lane.b32.xlu0 %v2009_v45, %s1795_s19  ;;  %439 = vrot.lane.b32.xlu1 %v2000_v40, %s1795_s19 }
  0xc3   :  { %493 = vrot.lane.b32.xlu0 %v2009_v45, %s1797_s20  ;;  %441 = vrot.lane.b32.xlu1 %v2002_v41, %s1795_s19 }
  0xc7   :  { %543 = vrot.lane.b32.xlu0 %v2009_v45, %s1798_s21  ;;  %445 = vrot.lane.b32.xlu1 %v2007_v44, %s1795_s19 }
  0xcb   :  { %593 = vrot.lane.b32.xlu0 %v2009_v45, %s1799_s22  ;;  %489 = vrot.lane.b32.xlu1 %v2000_v40, %s1797_s20 }
  0xcf   :  { %643 = vrot.lane.b32.xlu0 %v2009_v45, %s1800_s23  ;;  %491 = vrot.lane.b32.xlu1 %v2002_v41, %s1797_s20 }
  0xd3   :  { %693 = vrot.lane.b32.xlu0 %v2009_v45, %s1801_s24  ;;  %495 = vrot.lane.b32.xlu1 %v2007_v44, %s1797_s20 }
  0xd7   :  { %743 = vrot.lane.b32.xlu0 %v2009_v45, %s1802_s25  ;;  %539 = vrot.lane.b32.xlu1 %v2000_v40, %s1798_s21 }
  0xdb   :  { %793 = vrot.lane.b32.xlu0 %v2009_v45, %s1803_s26  ;;  %541 = vrot.lane.b32.xlu1 %v2002_v41, %s1798_s21 }
  0xdf   :  { %843 = vrot.lane.b32.xlu0 %v2009_v45, %s1804_s27  ;;  %545 = vrot.lane.b32.xlu1 %v2007_v44, %s1798_s21 }
  0xe3   :  { %853 = vperm.xlu0 %1751, %v1884_v7   ;;  %589 = vrot.lane.b32.xlu1 %v2000_v40, %s1799_s22 }
  0xe7   :  { %893 = vrot.lane.b32.xlu0 %v2009_v45, %s1805_s28  ;;  %591 = vrot.lane.b32.xlu1 %v2002_v41, %s1799_s22 }
  0xe8   :  { %1752 = vset.pattern.permute.xlu0 %v1806_v46 }
  0xeb   :  { %903 = vperm.xlu0 %1752, %v1884_v7   ;;  %595 = vrot.lane.b32.xlu1 %v2007_v44, %s1799_s22 }
  0xef   :  { %943 = vrot.lane.b32.xlu0 %v2009_v45, %s1807_s29  ;;  %639 = vrot.lane.b32.xlu1 %v2000_v40, %s1800_s23 }
  0xf0   :  { %1754 = vset.pattern.permute.xlu0 %v1808_v47 }
  0xf3   :  { %1003 = vperm.xlu0 %1754, %v1884_v7   ;;  %641 = vrot.lane.b32.xlu1 %v2002_v41, %s1800_s23 }
  0xf7   :  { %1756 = vset.pattern.permute.xlu0 %v1809_v48  ;;  %645 = vrot.lane.b32.xlu1 %v2007_v44, %s1800_s23 }
  0xf8   :  { %1103 = vperm.xlu0 %1756, %v1884_v7  }
  0xfb   :  { %689 = vrot.lane.b32.xlu1 %v2000_v40, %s1801_s24 }
  0xfc   :  { %993 = vrot.lane.b32.xlu0 %v2009_v45, %s1810_s30 }
  0xfd   :  { %1757 = vset.pattern.permute.xlu0 %v1811_v49 }
  0xff   :  { %691 = vrot.lane.b32.xlu1 %v2002_v41, %s1801_s24 }
 0x100   :  { %1153 = vperm.xlu0 %1757, %v1884_v7  }
 0x103   :  { %695 = vrot.lane.b32.xlu1 %v2007_v44, %s1801_s24 }
 0x104   :  { %1043 = vrot.lane.b32.xlu0 %v2009_v45, %s1812_s2 }
 0x105   :  { %1758 = vset.pattern.permute.xlu0 %v1813_v50 }
 0x107   :  { %739 = vrot.lane.b32.xlu1 %v2000_v40, %s1802_s25 }
 0x108   :  { %1190 = vperm.xlu0 %1758, %v1884_v7  }
 0x10b   :  { %741 = vrot.lane.b32.xlu1 %v2002_v41, %s1802_s25 }
 0x10c   :  { %1093 = vrot.lane.b32.xlu0 %v2009_v45, %s1814_s9 }
 0x10d   :  { %1759 = vset.pattern.permute.xlu0 %v1815_v18 }
 0x10f   :  { %745 = vrot.lane.b32.xlu1 %v2007_v44, %s1802_s25 }
 0x110   :  { %1227 = vperm.xlu0 %1759, %v1884_v7  }
 0x113   :  { %789 = vrot.lane.b32.xlu1 %v2000_v40, %s1803_s26 }
 0x114   :  { %1143 = vrot.lane.b32.xlu0 %v2009_v45, %s1816_s3 }
 0x115   :  { %1760 = vset.pattern.permute.xlu0 %v1817_v55 }
 0x117   :  { %791 = vrot.lane.b32.xlu1 %v2002_v41, %s1803_s26 }
 0x118   :  { %1264 = vperm.xlu0 %1760, %v1884_v7  }
 0x11b   :  { %795 = vrot.lane.b32.xlu1 %v2007_v44, %s1803_s26 }
 0x11c   :  { %1763 = vset.pattern.permute.xlu0 %v1818_v58  ;;  %v2243_v58 = vsel %vm48_vm9, 1.0, %v3352_v15 }
 0x11d   :  { %1375 = vperm.xlu0 %1763, %v1884_v7   ;;  %v522_v2 = vrot.slane %v2243_v58, %v1917_v24 }
 0x11f   :  { %839 = vrot.lane.b32.xlu1 %v2000_v40, %s1804_s27 }
 0x121   :  { %1766 = vset.pattern.permute.xlu0 %v1819_v61  ;;  %v2104_v62 = vpop.permute.xlu1 %337  ;;  %v340_v3 = vpop.permute.xlu0 %339 }
 0x122   :  { %1486 = vperm.xlu0 %1766, %v1884_v7   ;;  %v2225_v46 = vsel %vm347_vm7, %v2104_v62, %v340_v3 }
 0x123   :  { %841 = vrot.lane.b32.xlu1 %v2002_v41, %s1804_s27 }
 0x125   :  { %v2109_v63 = vpop.permute.xlu1 %341  ;;  %v344_v10 = vpop.permute.xlu0 %343 }
 0x126   :  { %1768 = vset.pattern.permute.xlu0 %v1784_v5  ;;  %v2133_v5 = vld [vmem:[%s3346_s1 + $0x1] ss:$4 sm:$0xf]  ;;  %v2230_v47 = vsel %vm347_vm7, %v340_v3, %v2109_v63  ;;  %v2249_v61 = vsel %vm347_vm7, %v344_v10, %v2104_v62  ;;  %v2254_v3 = vsel %vm347_vm7, %v2109_v63, %v344_v10  ;;  %v518_v10 = vrot.slane %v2243_v58, %v1906_v19 }
 0x127   :  { %1559 = vperm.xlu0 %1768, %v2114_v1   ;;  %845 = vrot.lane.b32.xlu1 %v2007_v44, %s1804_s27  ;;  %vm39_vm1 = vcmp.ge.s32.totalorder %v2133_v5, 1  ;;  %3395 = vst [vmem:[#allocation2_spill] sm:$0xff] %v2230_v47  ;;  %3396 = vst [vmem:[#allocation3_spill] sm:$0xff] %v2249_v61  ;;  %v358_v4 = vmul.f32 %v2097_v59, %v2230_v47  ;;  %v356_v55 = vmul.f32 %v2097_v59, %v2249_v61  ;;  %v1821_v47 = vmov 15  }
 0x128   :  { %vm41_vm3 = vmand %vm38_vm0, %vm39_vm1  ;;  %3397 = vst [vmem:[#allocation4_spill] sm:$0xff] %v2254_v3  ;;  %vm53_vm15 = vcmp.lt.s32.totalorder %v2133_v5, 7 }
 0x129   :  { %v2123_v8 = vpop.permute.xlu1 %391  ;;  %v2156_v13 = vpop.permute.xlu0 %389  ;;  %vm42_vm4 = vmand %vm41_vm3, %vm40_vm2  ;;  %v2170_v22 = vsel %vm41_vm3, 1.0, %v3352_v15 }
 0x12a   :  { %v2167_v20 = vsel %vm42_vm4, 1.0, %v3352_v15  ;;  %vm46_vm6 = vmand %vm41_vm3, %vm45_vm5  ;;  %v418_v35 = vrot.slane %v2170_v22, %v1906_v19  ;;  %v422_v43 = vrot.slane %v2170_v22, %v1917_v24  ;;  %v2270_v62 = vsel %vm397_vm8, %v2156_v13, %v2123_v8 }
 0x12b   :  { %1771 = vset.pattern.permute.xlu0 %v3351_v0  ;;  %889 = vrot.lane.b32.xlu1 %v2000_v40, %s1805_s28  ;;  %v368_v16 = vrot.slane %v2167_v20, %v1906_v19  ;;  %v364_v26 = vrot.slane %v2167_v20, %v1909_v21  ;;  %v372_v30 = vrot.slane %v2167_v20, %v1917_v24  ;;  %v2191_v36 = vsel %vm46_vm6, 1.0, %v3352_v15  ;;  %vm2458_vm3 = vmand %vm38_vm0, %vm53_vm15 }
 0x12c   :  { %1644 = vperm.xlu0 %1771, %v1532_v6   ;;  %v376_v34 = vrot.slane %v2167_v20, %v1935_v28  ;;  %v468_v48 = vrot.slane %v2191_v36, %v1906_v19  ;;  %v472_v49 = vrot.slane %v2191_v36, %v1917_v24  ;;  %v2260_v6 = vsel %vm38_vm0, 1.0, %v3352_v15  ;;  %3398 = vst [vmem:[#allocation5_spill] sm:$0xff] %v2270_v62  ;;  %vm55_vm0 = vmand %vm2458_vm3, %vm40_vm2 }
 0x12d   :  { %v2145_v12 = vpop.permute.xlu1 %395  ;;  %v394_v29 = vpop.permute.xlu0 %393  ;;  %v357_v20 = vmul.f32 %v2097_v59, %v2225_v46  ;;  %v407_v15 = vmul.f32 %v1945_v33, %v2270_v62  ;;  %vm647_vm4 = vcmp.lt.s32.totalorder %v2164_v27, 57  ;;  %vm697_vm6 = vcmp.lt.s32.totalorder %v2164_v27, 56  ;;  %vm58_vm7 = vmand %vm2458_vm3, %vm45_vm5 }
 0x12e   :  { %v2275_v63 = vsel %vm397_vm8, %v2123_v8, %v394_v29  ;;  %v359_v8 = vmul.f32 %v2097_v59, %v2254_v3  ;;  %v383_v3 = vmul.f32 %v372_v30, %v358_v4  ;;  %v2314_v62 = vsel %vm397_vm8, %v2145_v12, %v2156_v13  ;;  %vm60_vm9 = vmand %vm39_vm1, %vm40_vm2 }
 0x12f   :  { %891 = vrot.lane.b32.xlu1 %v2002_v41, %s1805_s28  ;;  %3399 = vst [vmem:[#allocation6_spill] sm:$0xff] %v2275_v63  ;;  %v408_v56 = vmul.f32 %v1945_v33, %v2275_v63  ;;  %v382_v61 = vmul.f32 %v368_v16, %v357_v20  ;;  %v381_v13 = vmul.f32 %v364_v26, %v356_v55  ;;  %v1822_v55 = vmov 21  }
 0x130   :  { %v384_v30 = vmul.f32 %v376_v34, %v359_v8  ;;  %v432_v20 = vmul.f32 %v418_v35, %v407_v15 }
 0x131   :  { %v2154_v25 = vpop.permute.xlu1 %439  ;;  %v444_v18 = vpop.permute.xlu0 %443  ;;  %v433_v59 = vmul.f32 %v422_v43, %v408_v56  ;;  %v386_v35 = vadd.f32 %v382_v61, %v2199_v38 }
 0x133   :  { %895 = vrot.lane.b32.xlu1 %v2007_v44, %s1805_s28 }
 0x135   :  { %v442_v14 = vpop.permute.xlu1 %441  ;;  %v494_v63 = vpop.permute.xlu0 %493 }
 0x136   :  { %v2291_v45 = vsel %vm447_vm10, %v442_v14, %v444_v18  ;;  %v2296_v17 = vsel %vm447_vm10, %v2154_v25, %v442_v14  ;;  %v2308_v14 = vsel %vm397_vm8, %v394_v29, %v2145_v12  ;;  %vm747_vm8 = vcmp.lt.s32.totalorder %v2164_v27, 55 }
 0x137   :  { %939 = vrot.lane.b32.xlu1 %v2000_v40, %s1807_s29  ;;  %3400 = vst [vmem:[#allocation7_spill] sm:$0xff] %v2291_v45  ;;  %3401 = vst [vmem:[#allocation8_spill] sm:$0xff] %v2296_v17  ;;  %v458_v4 = vmul.f32 %v1972_v52, %v2291_v45  ;;  %v409_v26 = vmul.f32 %v1945_v33, %v2308_v14 }
 0x139   :  { %v2183_v31 = vpop.permute.xlu1 %445  ;;  %v483_v43 = vmul.f32 %v472_v49, %v458_v4  ;;  %v436_v49 = vadd.f32 %v432_v20, %v386_v35 }
 0x13a   :  { %v2335_v45 = vsel %vm447_vm10, %v444_v18, %v2183_v31 }
 0x13b   :  { %941 = vrot.lane.b32.xlu1 %v2002_v41, %s1807_s29  ;;  %v459_v56 = vmul.f32 %v1972_v52, %v2335_v45 }
 0x13d   :  { %v2236_v50 = vpop.permute.xlu1 %489 }
 0x13f   :  { %953 = vperm.xlu1 %1753, %v1884_v7  }
 0x141   :  { %v492_v0 = vpop.permute.xlu1 %491 }
 0x142   :  { %v2323_v16 = vsel %vm497_vm11, %v492_v0, %v494_v63  ;;  %v2328_v29 = vsel %vm497_vm11, %v2236_v50, %v492_v0  ;;  %v406_v0 = vmul.f32 %v1945_v33, %v2314_v62 }
 0x143   :  { %1755 = vset.pattern.permute.xlu1 %v1821_v47  ;;  %v457_v47 = vmul.f32 %v1972_v52, %v2296_v17  ;;  %3402 = vst [vmem:[#allocation9_spill] sm:$0xff] %v2323_v16  ;;  %3403 = vst [vmem:[#allocation10_spill] sm:$0xff] %v2328_v29  ;;  %v2341_v17 = vsel %vm447_vm10, %v2183_v31, %v2154_v25  ;;  %v507_v15 = vmul.f32 %v1978_v11, %v2328_v29  ;;  %v3447_v29 = vld [vmem:[#allocation4_spill] sm:$0xff] }
 0x144   :  { %1053 = vperm.xlu1 %1755, %v1884_v7   ;;  %v572_v7 = vrot.slane %v2260_v6, %v1917_v24  ;;  %v508_v34 = vmul.f32 %v1978_v11, %v2323_v16  ;;  %v387_v25 = vadd.f32 %v383_v3, %v2203_v32  ;;  %v456_v33 = vmul.f32 %v1972_v52, %v2341_v17 }
 0x145   :  { %v496_v12 = vpop.permute.xlu1 %495  ;;  %v482_v31 = vmul.f32 %v468_v48, %v457_v47  ;;  %v385_v32 = vadd.f32 %v381_v13, %v2195_v37  ;;  %v388_v48 = vadd.f32 %v384_v30, %v2207_v39  ;;  %v3406_v3 = vrot.slane %v2170_v22, %v1909_v21  ;;  %v544_v37 = vpop.permute.xlu0 %543 }
 0x146   :  { %v2361_v8 = vsel %vm497_vm11, %v494_v63, %v496_v12  ;;  %v2366_v38 = vsel %vm497_vm11, %v496_v12, %v2236_v50  ;;  %v437_v61 = vadd.f32 %v433_v59, %v387_v25  ;;  %v3407_v52 = vrot.slane %v2170_v22, %v1935_v28 }
 0x147   :  { %3404 = vst [vmem:[#allocation11_spill] sm:$0xff] %v2361_v8  ;;  %3405 = vst [vmem:[#allocation12_spill] sm:$0xff] %v2366_v38  ;;  %v431_v47 = vmul.f32 %v3406_v3, %v406_v0  ;;  %v532_v4 = vmul.f32 %v518_v10, %v507_v15  ;;  %v486_v50 = vadd.f32 %v482_v31, %v436_v49  ;;  %vm797_vm10 = vcmp.lt.s32.totalorder %v2164_v27, 9 }
 0x148   :  { %945 = vrot.lane.b32.xlu1 %v2007_v44, %s1807_s29  ;;  %v434_v63 = vmul.f32 %v3407_v52, %v409_v26  ;;  %v487_v12 = vadd.f32 %v483_v43, %v437_v61  ;;  %v506_v39 = vmul.f32 %v1978_v11, %v2366_v38  ;;  %v509_v59 = vmul.f32 %v1978_v11, %v2361_v8 }
 0x149   :  { %v540_v18 = vpop.permute.xlu1 %539  ;;  %1761 = vset.pattern.permute.xlu1 %v1822_v55  ;;  %v533_v55 = vmul.f32 %v522_v2, %v508_v34  ;;  %v3408_v30 = vrot.slane %v2191_v36, %v1909_v21  ;;  %v3409_v2 = vrot.slane %v2191_v36, %v1935_v28  ;;  %v564_v15 = vrot.slane %v2260_v6, %v1909_v21 }
 0x14a   :  { %v576_v36 = vrot.slane %v2260_v6, %v1935_v28  ;;  %v435_v34 = vadd.f32 %v431_v47, %v385_v32  ;;  %v438_v35 = vadd.f32 %v434_v63, %v388_v48  ;;  %v536_v25 = vadd.f32 %v532_v4, %v486_v50 }
 0x14b   :  { %v481_v22 = vmul.f32 %v3408_v30, %v456_v33  ;;  %v484_v10 = vmul.f32 %v3409_v2, %v459_v56  ;;  %v537_v31 = vadd.f32 %v533_v55, %v487_v12  ;;  %v3412_v43 = vrot.slane %v2243_v58, %v1909_v21 }
 0x14c   :  { %989 = vrot.lane.b32.xlu1 %v2000_v40, %s1810_s30  ;;  %v3413_v56 = vrot.slane %v2243_v58, %v1935_v28  ;;  %v3414_v61 = vrot.slane %v2260_v6, %v1906_v19  ;;  %vm847_vm11 = vcmp.lt.s32.totalorder %v2164_v27, 8 }
 0x14d   :  { %v542_v13 = vpop.permute.xlu1 %541  ;;  %v531_v33 = vmul.f32 %v3412_v43, %v506_v39  ;;  %v485_v48 = vadd.f32 %v481_v22, %v435_v34  ;;  %v488_v47 = vadd.f32 %v484_v10, %v438_v35 }
 0x14e   :  { %v2390_v20 = vsel %vm547_vm12, %v542_v13, %v544_v37  ;;  %v2394_v0 = vsel %vm547_vm12, %v540_v18, %v542_v13  ;;  %v534_v49 = vmul.f32 %v3413_v56, %v509_v59  ;;  %v3417_v59 = vmov 0.0  }
 0x14f   :  { %3410 = vst [vmem:[#allocation13_spill] sm:$0xff] %v2390_v20  ;;  %3411 = vst [vmem:[#allocation14_spill] sm:$0xff] %v2394_v0  ;;  %v557_v11 = vmul.f32 %v1986_v42, %v2394_v0  ;;  %v558_v26 = vmul.f32 %v1986_v42, %v2390_v20  ;;  %v52_v13 = vsel %vm51_vm13, 1.0, %v3417_v59  ;;  %vm897_vm13 = vcmp.lt.s32.totalorder %v2164_v27, 7 }
 0x150   :  { %991 = vrot.lane.b32.xlu1 %v2002_v41, %s1810_s30  ;;  %v538_v12 = vadd.f32 %v534_v49, %v488_v47  ;;  %v618_v2 = vrot.slane %v52_v13, %v1906_v19  ;;  %v622_v10 = vrot.slane %v52_v13, %v1917_v24  ;;  %v614_v43 = vrot.slane %v52_v13, %v1909_v21 }
 0x151   :  { %v582_v3 = vmul.f32 %v3414_v61, %v557_v11  ;;  %v583_v52 = vmul.f32 %v572_v7, %v558_v26  ;;  %v546_v32 = vpop.permute.xlu1 %545  ;;  %v535_v7 = vadd.f32 %v531_v33, %v485_v48  ;;  %v626_v33 = vrot.slane %v52_v13, %v1935_v28 }
 0x152   :  { %v2417_v63 = vsel %vm547_vm12, %v544_v37, %v546_v32  ;;  %v2421_v4 = vsel %vm547_vm12, %v546_v32, %v540_v18  ;;  %vm63_vm12 = vmand %vm39_vm1, %vm45_vm5 }
 0x153   :  { %3415 = vst [vmem:[#allocation15_spill] sm:$0xff] %v2417_v63  ;;  %3416 = vst [vmem:[#allocation16_spill] sm:$0xff] %v2421_v4  ;;  %v586_v55 = vadd.f32 %v582_v3, %v536_v25  ;;  %v587_v50 = vadd.f32 %v583_v52, %v537_v31  ;;  %v556_v58 = vmul.f32 %v1986_v42, %v2421_v4 }
 0x154   :  { %v559_v6 = vmul.f32 %v1986_v42, %v2417_v63  ;;  %995 = vrot.lane.b32.xlu1 %v2007_v44, %s1810_s30  ;;  %v594_v42 = vpop.permute.xlu0 %593 }
 0x155   :  { %v581_v18 = vmul.f32 %v564_v15, %v556_v58  ;;  %v590_v39 = vpop.permute.xlu1 %589 }
 0x156   :  { %v584_v37 = vmul.f32 %v576_v36, %v559_v6 }
 0x157   :  { %v585_v30 = vadd.f32 %v581_v18, %v535_v7 }
 0x158   :  { %v588_v22 = vadd.f32 %v584_v37, %v538_v12  ;;  %1039 = vrot.lane.b32.xlu1 %v2000_v40, %s1812_s2 }
 0x159   :  { %v592_v11 = vpop.permute.xlu1 %591 }
 0x15a   :  { %v2442_v26 = vsel %vm597_vm14, %v592_v11, %v594_v42  ;;  %v2446_v15 = vsel %vm597_vm14, %v590_v39, %v592_v11 }
 0x15b   :  { %v607_v36 = vmul.f32 %v2071_v51, %v2446_v15  ;;  %v608_v34 = vmul.f32 %v2071_v51, %v2442_v26 }
 0x15c   :  { %1041 = vrot.lane.b32.xlu1 %v2002_v41, %s1812_s2 }
 0x15d   :  { %v632_v25 = vmul.f32 %v618_v2, %v607_v36  ;;  %v633_v31 = vmul.f32 %v622_v10, %v608_v34  ;;  %v596_v56 = vpop.permute.xlu1 %595 }
 0x15e   :  { %v2466_v49 = vsel %vm597_vm14, %v594_v42, %v596_v56  ;;  %v2470_v61 = vsel %vm597_vm14, %v596_v56, %v590_v39  ;;  %vm72_vm14 = vcmp.lt.s32.totalorder %v2128_v9, 7 }
 0x15f   :  { %3420 = vst [vmem:[#allocation17_spill] sm:$0xff] %v2466_v49  ;;  %3421 = vst [vmem:[#allocation18_spill] sm:$0xff] %v2470_v61  ;;  %v636_v3 = vadd.f32 %v632_v25, %v586_v55  ;;  %v637_v52 = vadd.f32 %v633_v31, %v587_v50  ;;  %v606_v32 = vmul.f32 %v2071_v51, %v2470_v61  ;;  %v56_v55 = vsel %vm55_vm0, 1.0, %v3417_v59  ;;  %v3448_v61 = vld [vmem:[#allocation3_spill] sm:$0xff] }
 0x160   :  { %v609_v48 = vmul.f32 %v2071_v51, %v2466_v49  ;;  %1045 = vrot.lane.b32.xlu1 %v2007_v44, %s1812_s2  ;;  %v644_v51 = vpop.permute.xlu0 %643  ;;  %v668_v12 = vrot.slane %v56_v55, %v1906_v19  ;;  %v672_v18 = vrot.slane %v56_v55, %v1917_v24  ;;  %v664_v10 = vrot.slane %v56_v55, %v1909_v21 }
 0x161   :  { %v631_v47 = vmul.f32 %v614_v43, %v606_v32  ;;  %v640_v6 = vpop.permute.xlu1 %639  ;;  %v676_v11 = vrot.slane %v56_v55, %v1935_v28 }
 0x162   :  { %v634_v58 = vmul.f32 %v626_v33, %v609_v48 }
 0x163   :  { %v635_v50 = vadd.f32 %v631_v47, %v585_v30 }
 0x164   :  { %v638_v7 = vadd.f32 %v634_v58, %v588_v22  ;;  %1089 = vrot.lane.b32.xlu1 %v2000_v40, %s1814_s9  ;;  %v57_v58 = vsel %vm2458_vm3, 1.0, %v3417_v59  ;;  %vm73_vm3 = vmand %vm72_vm14, %vm39_vm1 }
 0x165   :  { %v642_v37 = vpop.permute.xlu1 %641  ;;  %vm74_vm0 = vmand %vm73_vm3, %vm40_vm2 }
 0x166   :  { %v2490_v39 = vsel %vm647_vm4, %v642_v37, %v644_v51  ;;  %v2494_v13 = vsel %vm647_vm4, %v640_v6, %v642_v37 }
 0x167   :  { %3422 = vst [vmem:[#allocation19_spill] sm:$0xff] %v2490_v39  ;;  %3423 = vst [vmem:[#allocation20_spill] sm:$0xff] %v2494_v13  ;;  %v657_v30 = vmul.f32 %v2077_v53, %v2494_v13  ;;  %v658_v22 = vmul.f32 %v2077_v53, %v2490_v39  ;;  %v2816_v39 = vsel %vm45_vm5, 1.0, %v3417_v59  ;;  %v2856_v13 = vsel %vm53_vm15, 1.0, %v3417_v59 }
 0x168   :  { %1091 = vrot.lane.b32.xlu1 %v2002_v41, %s1814_s9 }
 0x169   :  { %v682_v42 = vmul.f32 %v668_v12, %v657_v30  ;;  %v683_v2 = vmul.f32 %v672_v18, %v658_v22  ;;  %v646_v36 = vpop.permute.xlu1 %645  ;;  %v714_v30 = vrot.slane %v57_v58, %v1909_v21  ;;  %v726_v22 = vrot.slane %v57_v58, %v1935_v28 }
 0x16a   :  { %v2506_v34 = vsel %vm647_vm4, %v644_v51, %v646_v36  ;;  %v2510_v25 = vsel %vm647_vm4, %v646_v36, %v640_v6  ;;  %vm2735_vm4 = vmand %vm72_vm14, %vm53_vm15 }
 0x16b   :  { %3424 = vst [vmem:[#allocation21_spill] sm:$0xff] %v2506_v34  ;;  %3425 = vst [vmem:[#allocation22_spill] sm:$0xff] %v2510_v25  ;;  %v686_v31 = vadd.f32 %v682_v42, %v636_v3  ;;  %v687_v43 = vadd.f32 %v683_v2, %v637_v52  ;;  %v656_v33 = vmul.f32 %v2077_v53, %v2510_v25  ;;  %v694_v3 = vpop.permute.xlu0 %693  ;;  %v2903_v25 = vsel %vm72_vm14, 1.0, %v3417_v59 }
 0x16c   :  { %v659_v56 = vmul.f32 %v2077_v53, %v2506_v34  ;;  %1095 = vrot.lane.b32.xlu1 %v2007_v44, %s1814_s9  ;;  %v718_v53 = vrot.slane %v57_v58, %v1906_v19  ;;  %v722_v52 = vrot.slane %v57_v58, %v1917_v24  ;;  %3444 = vst [vmem:[#allocation34_spill] sm:$0xff] %v2903_v25 }
 0x16d   :  { %v681_v32 = vmul.f32 %v664_v10, %v656_v33  ;;  %v690_v47 = vpop.permute.xlu1 %689 }
 0x16e   :  { %v684_v48 = vmul.f32 %v676_v11, %v659_v56 }
 0x16f   :  { %v685_v6 = vadd.f32 %v681_v32, %v635_v50  ;;  %v744_v58 = vpop.permute.xlu0 %743 }
 0x170   :  { %v688_v55 = vadd.f32 %v684_v48, %v638_v7  ;;  %1139 = vrot.lane.b32.xlu1 %v2000_v40, %s1816_s3 }
 0x171   :  { %v692_v51 = vpop.permute.xlu1 %691 }
 0x172   :  { %v2528_v12 = vsel %vm697_vm6, %v692_v51, %v694_v3  ;;  %v2532_v18 = vsel %vm697_vm6, %v690_v47, %v692_v51  ;;  %v1823_v51 = vmov 22  }
 0x173   :  { %3426 = vst [vmem:[#allocation23_spill] sm:$0xff] %v2528_v12  ;;  %3427 = vst [vmem:[#allocation24_spill] sm:$0xff] %v2532_v18  ;;  %v707_v50 = vmul.f32 %v2086_v54, %v2532_v18  ;;  %v708_v40 = vmul.f32 %v2086_v54, %v2528_v12 }
 0x174   :  { %1141 = vrot.lane.b32.xlu1 %v2002_v41, %s1816_s3 }
 0x175   :  { %v732_v7 = vmul.f32 %v718_v53, %v707_v50  ;;  %v733_v37 = vmul.f32 %v722_v52, %v708_v40  ;;  %v696_v42 = vpop.permute.xlu1 %695 }
 0x176   :  { %v2544_v2 = vsel %vm697_vm6, %v694_v3, %v696_v42  ;;  %v2548_v10 = vsel %vm697_vm6, %v696_v42, %v690_v47  ;;  %vm82_vm6 = vmand %vm72_vm14, %vm45_vm5 }
 0x177   :  { %3428 = vst [vmem:[#allocation25_spill] sm:$0xff] %v2544_v2  ;;  %3429 = vst [vmem:[#allocation26_spill] sm:$0xff] %v2548_v10  ;;  %v736_v11 = vadd.f32 %v732_v7, %v686_v31  ;;  %v737_v36 = vadd.f32 %v733_v37, %v687_v43  ;;  %v706_v41 = vmul.f32 %v2086_v54, %v2548_v10  ;;  %v59_v31 = vsel %vm58_vm7, 1.0, %v3417_v59 }
 0x178   :  { %v709_v33 = vmul.f32 %v2086_v54, %v2544_v2  ;;  %1145 = vrot.lane.b32.xlu1 %v2007_v44, %s1816_s3  ;;  %v1776_v54 = vld [vmem:[%s3342_s4] sm:$0xf]  ;;  %v768_v35 = vrot.slane %v59_v31, %v1906_v19  ;;  %v772_v3 = vrot.slane %v59_v31, %v1917_v24  ;;  %v764_v7 = vrot.slane %v59_v31, %v1909_v21  ;;  %vm88_vm7 = vmand %vm2735_vm4, %vm45_vm5 }
 0x179   :  { %v731_v56 = vmul.f32 %v714_v30, %v706_v41  ;;  %v740_v48 = vpop.permute.xlu1 %739  ;;  %v776_v37 = vrot.slane %v59_v31, %v1935_v28  ;;  %v2771_v18 = vsel %vm82_vm6, 1.0, %v3417_v59 }
 0x17a   :  { %v734_v32 = vmul.f32 %v726_v22, %v709_v33  ;;  %3439 = vst [vmem:[#allocation31_spill] sm:$0xff] %v2771_v18 }
 0x17b   :  { %v735_v43 = vadd.f32 %v731_v56, %v685_v6 }
 0x17c   :  { %v738_v47 = vadd.f32 %v734_v32, %v688_v55  ;;  %1301 = vperm.xlu1 %1761, %v1776_v54  }
 0x17d   :  { %v742_v44 = vpop.permute.xlu1 %741 }
 0x17e   :  { %v2569_v53 = vsel %vm747_vm8, %v742_v44, %v744_v58  ;;  %v2573_v6 = vsel %vm747_vm8, %v740_v48, %v742_v44  ;;  %v794_v44 = vpop.permute.xlu0 %793 }
 0x17f   :  { %3430 = vst [vmem:[#allocation27_spill] sm:$0xff] %v2569_v53  ;;  %3431 = vst [vmem:[#allocation28_spill] sm:$0xff] %v2573_v6  ;;  %v757_v55 = vmul.f32 %v2093_v57, %v2573_v6  ;;  %v758_v52 = vmul.f32 %v2093_v57, %v2569_v53  ;;  %v3445_v6 = vld [vmem:[#allocation2_spill] sm:$0xff] }
 0x180   :  { %1762 = vset.pattern.permute.xlu1 %v1823_v51 }
 0x181   :  { %v782_v50 = vmul.f32 %v768_v35, %v757_v55  ;;  %v783_v40 = vmul.f32 %v772_v3, %v758_v52  ;;  %1338 = vperm.xlu1 %1762, %v1776_v54   ;;  %v746_v30 = vpop.permute.xlu1 %745  ;;  %v1824_v35 = vmov 24  }
 0x182   :  { %v2583_v22 = vsel %vm747_vm8, %v744_v58, %v746_v30  ;;  %v2587_v42 = vsel %vm747_vm8, %v746_v30, %v740_v48  ;;  %vm67_vm8 = vmand %vm53_vm15, %vm40_vm2 }
 0x183   :  { %3432 = vst [vmem:[#allocation29_spill] sm:$0xff] %v2583_v22  ;;  %3433 = vst [vmem:[#allocation30_spill] sm:$0xff] %v2587_v42  ;;  %v786_v41 = vadd.f32 %v782_v50, %v736_v11  ;;  %v787_v33 = vadd.f32 %v783_v40, %v737_v36  ;;  %v756_v56 = vmul.f32 %v2093_v57, %v2587_v42  ;;  %v61_v11 = vsel %vm60_vm9, 1.0, %v3417_v59 }
 0x184   :  { %v759_v32 = vmul.f32 %v2093_v57, %v2583_v22  ;;  %v818_v57 = vrot.slane %v61_v11, %v1906_v19  ;;  %v822_v55 = vrot.slane %v61_v11, %v1917_v24  ;;  %v1825_v40 = vmov 25   ;;  %vm70_vm9 = vmand %vm53_vm15, %vm45_vm5 }
 0x185   :  { %v781_v31 = vmul.f32 %v764_v7, %v756_v56  ;;  %1764 = vset.pattern.permute.xlu1 %v1824_v35  ;;  %v790_v3 = vpop.permute.xlu1 %789  ;;  %v814_v30 = vrot.slane %v61_v11, %v1909_v21  ;;  %v826_v56 = vrot.slane %v61_v11, %v1935_v28  ;;  %v2782_v42 = vsel %vm88_vm7, 1.0, %v3417_v59 }
 0x186   :  { %v784_v58 = vmul.f32 %v776_v37, %v759_v32  ;;  %1412 = vperm.xlu1 %1764, %v1776_v54   ;;  %3440 = vst [vmem:[#allocation32_spill] sm:$0xff] %v2782_v42  ;;  %v2801_v22 = vsel %vm40_vm2, 1.0, %v3417_v59  ;;  %v2867_v4 = vsel %vm70_vm9, 1.0, %v3417_v59  ;;  %vm997_vm15 = vcmp.lt.s32.totalorder %v2164_v27, 127 }
 0x187   :  { %v785_v36 = vadd.f32 %v781_v31, %v735_v43  ;;  %v327_v31 = vld [vmem:[%s3347_s5] sm:$0xf] }
 0x188   :  { %v788_v48 = vadd.f32 %v784_v58, %v738_v47 }
 0x189   :  { %v792_v52 = vpop.permute.xlu1 %791 }
 0x18a   :  { %v799_v51 = vsel %vm797_vm10, %v792_v52, %v794_v44  ;;  %v800_v50 = vsel %vm797_vm10, %v790_v3, %v792_v52  ;;  %1765 = vset.pattern.permute.xlu1 %v1825_v40  ;;  %v844_v52 = vpop.permute.xlu0 %843 }
 0x18b   :  { %v807_v7 = vmul.f32 %v2102_v60, %v800_v50  ;;  %v808_v43 = vmul.f32 %v2102_v60, %v799_v51  ;;  %1449 = vperm.xlu1 %1765, %v1776_v54   ;;  %v3434_v50 = vmov 0  }
 0x18d   :  { %v832_v47 = vmul.f32 %v818_v57, %v807_v7  ;;  %v833_v37 = vmul.f32 %v822_v55, %v808_v43  ;;  %v796_v32 = vpop.permute.xlu1 %795 }
 0x18e   :  { %v798_v58 = vsel %vm797_vm10, %v794_v44, %v796_v32  ;;  %v801_v35 = vsel %vm797_vm10, %v796_v32, %v790_v3  ;;  %v62_v44 = vsel %vm39_vm1, 1.0, %v3417_v59  ;;  %v854_v43 = vpop.permute.xlu0 %853  ;;  %v3435_v32 = vmov 2   ;;  %vm77_vm1 = vmand %vm73_vm3, %vm45_vm5 }
 0x18f   :  { %v836_v51 = vadd.f32 %v832_v47, %v786_v41  ;;  %v837_v54 = vadd.f32 %v833_v37, %v787_v33  ;;  %v806_v57 = vmul.f32 %v2102_v60, %v801_v35  ;;  %v809_v55 = vmul.f32 %v2102_v60, %v798_v58  ;;  %1767 = vset.pattern.permute.xlu1 %v3434_v50  ;;  %vm79_vm10 = vmand %vm72_vm14, %vm40_vm2 }
 0x190   :  { %1524 = vperm.xlu1 %1767, %v327_v31   ;;  %v868_v41 = vrot.slane %v62_v44, %v1906_v19  ;;  %v872_v60 = vrot.slane %v62_v44, %v1917_v24  ;;  %v864_v58 = vrot.slane %v62_v44, %v1909_v21  ;;  %v876_v35 = vrot.slane %v62_v44, %v1935_v28  ;;  %vm2890_vm5 = vmand %vm2735_vm4, %vm40_vm2 }
 0x191   :  { %v831_v11 = vmul.f32 %v814_v30, %v806_v57  ;;  %v834_v40 = vmul.f32 %v826_v56, %v809_v55  ;;  %v840_v7 = vpop.permute.xlu1 %839  ;;  %v3436_v44 = vmov 3   ;;  %v2876_v0 = vsel %vm79_vm10, 1.0, %v3417_v59 }
 0x192   :  { %3441 = vst [vmem:[#allocation33_spill] sm:$0xff] %v2876_v0  ;;  %vm947_vm2 = vcmp.lt.s32.totalorder %v2164_v27, 1  ;;  %v2928_v63 = vsel %vm2890_vm5, 1.0, %v3417_v59  ;;  %v3452_v0 = vld [vmem:[#allocation6_spill] sm:$0xff] }
 0x193   :  { %v835_v10 = vadd.f32 %v831_v11, %v785_v36  ;;  %v838_v3 = vadd.f32 %v834_v40, %v788_v48  ;;  %v2631_v36 = vpop.permute.xlu0 %893  ;;  %3446 = vst [vmem:[#allocation2_spill] sm:$0xff] %v2928_v63 }
 0x194   :  { %1535 = vperm.xlu1 %1767, %v2114_v1  }
 0x195   :  { %v842_v33 = vpop.permute.xlu1 %841 }
 0x196   :  { %v849_v47 = vsel %vm847_vm11, %v842_v33, %v844_v52  ;;  %v850_v37 = vsel %vm847_vm11, %v840_v7, %v842_v33 }
 0x197   :  { %v857_v30 = vmul.f32 %v854_v43, %v850_v37  ;;  %v858_v56 = vmul.f32 %v854_v43, %v849_v47 }
 0x198   :  { %1769 = vset.pattern.permute.xlu1 %v3435_v32  ;;  %v1780_v32 = vld [vmem:[%s3343_s0 + $0x18] sm:$0xff] }
 0x199   :  { %v882_v48 = vmul.f32 %v868_v41, %v857_v30  ;;  %v883_v31 = vmul.f32 %v872_v60, %v858_v56  ;;  %1587 = vperm.xlu1 %1769, %v2114_v1   ;;  %v846_v57 = vpop.permute.xlu1 %845  ;;  %v1778_v30 = vld [vmem:[%s3343_s0 + $0x8] sm:$0xff] }
 0x19a   :  { %v848_v55 = vsel %vm847_vm11, %v844_v52, %v846_v57  ;;  %v851_v50 = vsel %vm847_vm11, %v846_v57, %v840_v7  ;;  %v2649_v52 = vsel %vm63_vm12, 1.0, %v3417_v59  ;;  %vm1047_vm11 = vcmp.lt.s32.totalorder %v2164_v27, 121 }
 0x19b   :  { %v886_v11 = vadd.f32 %v882_v48, %v836_v51  ;;  %v2640_v40 = vadd.f32 %v883_v31, %v837_v54  ;;  %v856_v33 = vmul.f32 %v854_v43, %v851_v50  ;;  %v859_v47 = vmul.f32 %v854_v43, %v848_v55  ;;  %v2652_v51 = vpop.permute.xlu0 %903  ;;  %v1777_v43 = vld [vmem:[%s3343_s0] sm:$0xff] }
 0x19c   :  { %v1669_v56 = vcombine.low %v1777_v43, %v1778_v30  ;;  %vm1097_vm12 = vcmp.lt.s32.totalorder %v2164_v27, 120 }
 0x19d   :  { %v881_v41 = vmul.f32 %v864_v58, %v856_v33  ;;  %v884_v60 = vmul.f32 %v876_v35, %v859_v47  ;;  %1770 = vset.pattern.permute.xlu1 %v3436_v44  ;;  %v890_v37 = vpop.permute.xlu1 %889  ;;  %v918_v58 = vrot.slane %v2649_v52, %v1906_v19  ;;  %v914_v47 = vrot.slane %v2649_v52, %v1909_v21 }
 0x19e   :  { %1615 = vperm.xlu1 %1770, %v2114_v1   ;;  %v1779_v1 = vld [vmem:[%s3343_s0 + $0x10] sm:$0xff]  ;;  %1673 = vst [vmem:[%s3348_s8] sm:$0x33] %v1669_v56 }
 0x19f   :  { %v885_v54 = vadd.f32 %v881_v41, %v835_v10  ;;  %v2654_v7 = vadd.f32 %v884_v60, %v838_v3  ;;  %v1670_v10 = vcombine.low %v1779_v1, %v1780_v32  ;;  %v1675_v3 = vcombine.high %v1777_v43, %v1778_v30  ;;  %v2688_v33 = vpop.permute.xlu0 %943 }
 0x1a0   :  { %v1676_v48 = vcombine.high %v1779_v1, %v1780_v32 }
 0x1a1   :  { %v2668_v31 = vpop.permute.xlu1 %891  ;;  %1674 = vst [vmem:[%s3348_s8 + $0x8] sm:$0x33] %v1670_v10  ;;  %v1677_v57 = vrot.slane %v1675_v3, 6 }
 0x1a2   :  { %v900_v35 = vsel %vm897_vm13, %v890_v37, %v2668_v31  ;;  %v1678_v55 = vrot.slane %v1676_v48, 6  ;;  %v899_v38 = vsel %vm897_vm13, %v2668_v31, %v2631_v36 }
 0x1a3   :  { %v907_v50 = vmul.f32 %v2652_v51, %v900_v35  ;;  %1681 = vst [vmem:[%s3348_s8] sm:$0xcc] %v1677_v57  ;;  %v2700_v1 = vpop.permute.xlu0 %1003  ;;  %v908_v25 = vmul.f32 %v2652_v51, %v899_v38 }
 0x1a4   :  { %1682 = vst [vmem:[%s3348_s8 + $0x8] sm:$0xcc] %v1678_v55 }
 0x1a5   :  { %v2692_v41 = vpop.permute.xlu1 %895  ;;  %v932_v60 = vmul.f32 %v918_v58, %v907_v50 }
 0x1a6   :  { %v901_v44 = vsel %vm897_vm13, %v2692_v41, %v890_v37  ;;  %v898_v9 = vsel %vm897_vm13, %v2631_v36, %v2692_v41  ;;  %vm1147_vm13 = vcmp.lt.s32.totalorder %v2164_v27, 119  ;;  %v3484_v27 = vrot.slane %v2867_v4, %v1917_v24 }
 0x1a7   :  { %v906_v43 = vmul.f32 %v2652_v51, %v901_v44  ;;  %v2698_v30 = vadd.f32 %v932_v60, %v886_v11  ;;  %v2704_v10 = vpop.permute.xlu0 %1103  ;;  %v2751_v44 = vsel %vm73_vm3, 1.0, %v3417_v59 }
 0x1a9   :  { %v931_v56 = vmul.f32 %v914_v47, %v906_v43  ;;  %v2706_v3 = vpop.permute.xlu1 %939  ;;  %v2740_v47 = vsel %vm74_vm0, 1.0, %v3417_v59  ;;  %v2841_v43 = vsel %vm67_vm8, 1.0, %v3417_v59 }
 0x1aa   :  { %v3450_v36 = vrot.slane %v2740_v47, %v1906_v19 }
 0x1ab   :  { %v2702_v32 = vadd.f32 %v931_v56, %v885_v54  ;;  %v2708_v48 = vpop.permute.xlu0 %993  ;;  %v2760_v56 = vsel %vm77_vm1, 1.0, %v3417_v59 }
 0x1ad   :  { %v2710_v58 = vpop.permute.xlu1 %941 }
 0x1af   :  { %v2712_v35 = vpop.permute.xlu0 %1153 }
 0x1b3   :  { %v2717_v11 = vpop.permute.xlu0 %1043 }
 0x1b7   :  { %v2729_v55 = vpop.permute.xlu0 %1190 }
 0x1b8   :  { %v1193_v23 = vmul.f32 %v2729_v55, %v2225_v46  ;;  %v1194_v18 = vmul.f32 %v2729_v55, %v3445_v6  ;;  %v1195_v16 = vmul.f32 %v2729_v55, %v3447_v29  ;;  %v1196_v42 = vmul.f32 %v2729_v55, %v3448_v61 }
 0x1b9   :  { %v3449_v6 = vrot.slane %v2740_v47, %v1909_v21  ;;  %v2976_v61 = vsel %vm2735_vm4, 1.0, %v3417_v59  ;;  %v909_v55 = vmul.f32 %v2652_v51, %v898_v9  ;;  %v3455_v59 = vrot.slane %v2740_v47, %v1935_v28 }
 0x1ba   :  { %v2967_v41 = vmul.f32 %v3450_v36, %v1194_v18  ;;  %3453 = vst [vmem:[#allocation4_spill] sm:$0xff] %v2976_v61  ;;  %v3459_v36 = vld [vmem:[#allocation7_spill] sm:$0xff] }
 0x1bb   :  { %v2768_v12 = vpop.permute.xlu0 %1093  ;;  %v2953_v46 = vmul.f32 %v3449_v6, %v1193_v23  ;;  %v3451_v23 = vld [vmem:[#allocation5_spill] sm:$0xff]  ;;  %v2993_v50 = vmul.f32 %v3455_v59, %v1196_v42  ;;  %v3456_v42 = vrot.slane %v2751_v44, %v1909_v21 }
 0x1be   :  { %v2714_v37 = vpop.permute.xlu1 %953 }
 0x1bf   :  { %v2832_v2 = vpop.permute.xlu0 %1227 }
 0x1c0   :  { %v1230_v6 = vmul.f32 %v2832_v2, %v3451_v23  ;;  %v1231_v49 = vmul.f32 %v2832_v2, %v3452_v0  ;;  %v3454_v0 = vrot.slane %v2740_v47, %v1917_v24  ;;  %v1232_v38 = vmul.f32 %v2832_v2, %v2308_v14 }
 0x1c1   :  { %v1233_v51 = vmul.f32 %v2832_v2, %v2314_v62  ;;  %v3457_v62 = vrot.slane %v2751_v44, %v1906_v19  ;;  %v3461_v47 = vrot.slane %v2649_v52, %v1935_v28 }
 0x1c2   :  { %v2988_v23 = vmul.f32 %v3454_v0, %v1195_v16  ;;  %v3010_v14 = vmul.f32 %v3456_v42, %v1230_v6  ;;  %v3458_v0 = vld [vmem:[#allocation8_spill] sm:$0xff]  ;;  %v3460_v16 = vrot.slane %v2649_v52, %v1917_v24 }
 0x1c3   :  { %v2719_v57 = vpop.permute.xlu1 %1053  ;;  %v2907_v5 = vpop.permute.xlu0 %1143  ;;  %v3015_v2 = vmul.f32 %v3457_v62, %v1231_v49  ;;  %v934_v61 = vmul.f32 %v3461_v47, %v909_v55  ;;  %v949_v55 = vsel %vm947_vm2, %v2710_v58, %v2688_v33 }
 0x1c4   :  { %v933_v63 = vmul.f32 %v3460_v16, %v908_v25  ;;  %v3463_v25 = vrot.slane %v2751_v44, %v1935_v28 }
 0x1c6   :  { %v3041_v52 = vmul.f32 %v3463_v25, %v1233_v51  ;;  %v3465_v25 = vrot.slane %v2760_v56, %v1906_v19 }
 0x1c7   :  { %v2725_v54 = vpop.permute.xlu1 %945  ;;  %v1265_v31 = vpop.permute.xlu0 %1264 }
 0x1c8   :  { %v1267_v59 = vmul.f32 %v1265_v31, %v3458_v0  ;;  %v1268_v18 = vmul.f32 %v1265_v31, %v3459_v36  ;;  %v948_v6 = vsel %vm947_vm2, %v2688_v33, %v2725_v54  ;;  %v951_v49 = vsel %vm947_vm2, %v2725_v54, %v2706_v3 }
 0x1c9   :  { %v3462_v36 = vrot.slane %v2751_v44, %v1917_v24  ;;  %v950_v54 = vsel %vm947_vm2, %v2706_v3, %v2710_v58  ;;  %v3062_v47 = vmul.f32 %v1265_v31, %v2335_v45  ;;  %v3065_v3 = vmul.f32 %v1265_v31, %v2341_v17 }
 0x1ca   :  { %v957_v16 = vmul.f32 %v2714_v37, %v950_v54  ;;  %v956_v58 = vmul.f32 %v2714_v37, %v951_v49  ;;  %v959_v62 = vmul.f32 %v2714_v37, %v948_v6  ;;  %v3464_v0 = vrot.slane %v2760_v56, %v1909_v21 }
 0x1cb   :  { %v2744_v60 = vpop.permute.xlu1 %989  ;;  %v3036_v42 = vmul.f32 %v3462_v36, %v1232_v38  ;;  %v958_v38 = vmul.f32 %v2714_v37, %v949_v55  ;;  %v937_v45 = vadd.f32 %v933_v63, %v2640_v40  ;;  %v938_v55 = vadd.f32 %v934_v61, %v2654_v7 }
 0x1cc   :  { %v3072_v36 = vmul.f32 %v3464_v0, %v1267_v59  ;;  %v3466_v63 = vrot.slane %v2801_v22, %v1906_v19  ;;  %v3467_v7 = vrot.slane %v2801_v22, %v1917_v24 }
 0x1ce   :  { %v982_v40 = vmul.f32 %v3466_v63, %v957_v16  ;;  %v983_v61 = vmul.f32 %v3467_v7, %v958_v38  ;;  %v3469_v16 = vrot.slane %v2801_v22, %v1935_v28 }
 0x1cf   :  { %v2773_v53 = vpop.permute.xlu1 %991 }
 0x1d0   :  { %v999_v44 = vsel %vm997_vm15, %v2773_v53, %v2708_v48  ;;  %v1000_v51 = vsel %vm997_vm15, %v2744_v60, %v2773_v53  ;;  %v3077_v53 = vmul.f32 %v3465_v25, %v1268_v18  ;;  %v986_v63 = vadd.f32 %v982_v40, %v2698_v30 }
 0x1d1   :  { %v1006_v17 = vmul.f32 %v2700_v1, %v1000_v51  ;;  %v1007_v37 = vmul.f32 %v2700_v1, %v999_v44  ;;  %v984_v44 = vmul.f32 %v3469_v16, %v959_v62  ;;  %v987_v7 = vadd.f32 %v983_v61, %v937_v45 }
 0x1d2   :  { %v3475_v45 = vrot.slane %v2816_v39, %v1935_v28 }
 0x1d3   :  { %v2818_v34 = vpop.permute.xlu1 %995 }
 0x1d4   :  { %v998_v59 = vsel %vm997_vm15, %v2708_v48, %v2818_v34  ;;  %v1001_v6 = vsel %vm997_vm15, %v2818_v34, %v2744_v60 }
 0x1d5   :  { %v1008_v25 = vmul.f32 %v2700_v1, %v998_v59 }
 0x1d7   :  { %v2864_v20 = vpop.permute.xlu1 %1039 }
 0x1db   :  { %v2910_v8 = vpop.permute.xlu1 %1041 }
 0x1dc   :  { %v1049_v31 = vsel %vm1047_vm11, %v2910_v8, %v2717_v11  ;;  %v1050_v18 = vsel %vm1047_vm11, %v2864_v20, %v2910_v8  ;;  %v3468_v8 = vrot.slane %v2801_v22, %v1909_v21 }
 0x1dd   :  { %v1056_v51 = vmul.f32 %v2719_v57, %v1050_v18  ;;  %v1057_v34 = vmul.f32 %v2719_v57, %v1049_v31  ;;  %v1009_v31 = vmul.f32 %v2700_v1, %v1001_v6  ;;  %v988_v6 = vadd.f32 %v984_v44, %v938_v55 }
 0x1de   :  { %v981_v54 = vmul.f32 %v3468_v8, %v956_v58  ;;  %v3470_v58 = vrot.slane %v2816_v39, %v1909_v21  ;;  %v3472_v8 = vrot.slane %v2841_v43, %v1909_v21  ;;  %v3477_v44 = vrot.slane %v2856_v13, %v1906_v19 }
 0x1df   :  { %v2956_v29 = vpop.permute.xlu1 %1045  ;;  %v1034_v40 = vmul.f32 %v3475_v45, %v1009_v31 }
 0x1e0   :  { %v1048_v60 = vsel %vm1047_vm11, %v2717_v11, %v2956_v29  ;;  %v1051_v22 = vsel %vm1047_vm11, %v2956_v29, %v2864_v20  ;;  %v1031_v62 = vmul.f32 %v3470_v58, %v1006_v17  ;;  %v985_v1 = vadd.f32 %v981_v54, %v2702_v32 }
 0x1e1   :  { %v1059_v59 = vmul.f32 %v2719_v57, %v1051_v22  ;;  %v1081_v16 = vmul.f32 %v3472_v8, %v1056_v51 }
 0x1e2   :  { %v1035_v55 = vadd.f32 %v1031_v62, %v985_v1  ;;  %v3482_v1 = vrot.slane %v2867_v4, %v1909_v21 }
 0x1e3   :  { %v1090_v9 = vpop.permute.xlu1 %1089 }
 0x1e4   :  { %v1085_v62 = vadd.f32 %v1081_v16, %v1035_v55  ;;  %v3483_v16 = vrot.slane %v2867_v4, %v1906_v19 }
 0x1e7   :  { %v1092_v33 = vpop.permute.xlu1 %1091 }
 0x1e8   :  { %v1099_v38 = vsel %vm1097_vm12, %v1092_v33, %v2768_v12  ;;  %v1100_v48 = vsel %vm1097_vm12, %v1090_v9, %v1092_v33  ;;  %v3471_v33 = vrot.slane %v2816_v39, %v1906_v19 }
 0x1e9   :  { %v1106_v18 = vmul.f32 %v2704_v10, %v1100_v48  ;;  %v1107_v11 = vmul.f32 %v2704_v10, %v1099_v38 }
 0x1ea   :  { %v1032_v0 = vmul.f32 %v3471_v33, %v1007_v37  ;;  %v1058_v37 = vmul.f32 %v2719_v57, %v1048_v60  ;;  %v3479_v60 = vrot.slane %v2841_v43, %v1935_v28 }
 0x1eb   :  { %v1096_v49 = vpop.permute.xlu1 %1095  ;;  %v1132_v48 = vmul.f32 %v3477_v44, %v1107_v11  ;;  %v3480_v11 = vrot.slane %v2856_v13, %v1917_v24 }
 0x1ec   :  { %v1098_v20 = vsel %vm1097_vm12, %v2768_v12, %v1096_v49  ;;  %v1101_v29 = vsel %vm1097_vm12, %v1096_v49, %v1090_v9  ;;  %v3473_v12 = vrot.slane %v2841_v43, %v1906_v19  ;;  %v3474_v9 = vrot.slane %v2816_v39, %v1917_v24 }
 0x1ed   :  { %v1108_v57 = vmul.f32 %v2704_v10, %v1098_v20  ;;  %v1109_v32 = vmul.f32 %v2704_v10, %v1101_v29  ;;  %v1036_v61 = vadd.f32 %v1032_v0, %v986_v63  ;;  %v3476_v49 = vrot.slane %v2856_v13, %v1909_v21  ;;  %v1376_v63 = vpop.permute.xlu0 %1375 }
 0x1ee   :  { %v1082_v38 = vmul.f32 %v3473_v12, %v1057_v34  ;;  %v1033_v30 = vmul.f32 %v3474_v9, %v1008_v25  ;;  %v3478_v34 = vrot.slane %v2841_v43, %v1917_v24  ;;  %v1084_v22 = vmul.f32 %v3479_v60, %v1059_v59 }
 0x1ef   :  { %v1140_v17 = vpop.permute.xlu1 %1139  ;;  %v1131_v54 = vmul.f32 %v3476_v49, %v1106_v18  ;;  %v1038_v18 = vadd.f32 %v1034_v40, %v988_v6  ;;  %v1133_v43 = vmul.f32 %v3480_v11, %v1108_v57  ;;  %v3481_v20 = vrot.slane %v2856_v13, %v1935_v28 }
 0x1f0   :  { %v1083_v39 = vmul.f32 %v3478_v34, %v1058_v37  ;;  %v1086_v33 = vadd.f32 %v1082_v38, %v1036_v61  ;;  %v1037_v31 = vadd.f32 %v1033_v30, %v987_v7  ;;  %v1379_v55 = vmul.f32 %v1376_v63, %v2442_v26  ;;  %v3488_v26 = vld [vmem:[#allocation10_spill] sm:$0xff] }
 0x1f1   :  { %v1134_v29 = vmul.f32 %v3481_v20, %v1109_v32  ;;  %v1135_v37 = vadd.f32 %v1131_v54, %v1085_v62  ;;  %v1088_v38 = vadd.f32 %v1084_v22, %v1038_v18  ;;  %v1378_v32 = vmul.f32 %v1376_v63, %v2446_v15  ;;  %v3487_v15 = vld [vmem:[#allocation18_spill] sm:$0xff]  ;;  %v3489_v22 = vld [vmem:[#allocation9_spill] sm:$0xff] }
 0x1f2   :  { %v1136_v59 = vadd.f32 %v1132_v48, %v1086_v33  ;;  %v1087_v12 = vadd.f32 %v1083_v39, %v1037_v31  ;;  %v1381_v39 = vmul.f32 %v1376_v63, %v3487_v15  ;;  %v3492_v31 = vld [vmem:[#allocation31_spill] sm:$0xff] }
 0x1f3   :  { %v1142_v51 = vpop.permute.xlu1 %1141  ;;  %v1138_v49 = vadd.f32 %v1134_v29, %v1088_v38  ;;  %v3493_v18 = vrot.slane %v3492_v31, %v1909_v21  ;;  %v3495_v29 = vld [vmem:[#allocation11_spill] sm:$0xff] }
 0x1f4   :  { %v1149_v10 = vsel %vm1147_vm13, %v1142_v51, %v2907_v5  ;;  %v1150_v58 = vsel %vm1147_vm13, %v1140_v17, %v1142_v51  ;;  %v1137_v61 = vadd.f32 %v1133_v43, %v1087_v12  ;;  %v3501_v12 = vrot.slane %v3492_v31, %v1935_v28 }
 0x1f5   :  { %v1156_v0 = vmul.f32 %v2712_v35, %v1150_v58  ;;  %v1157_v25 = vmul.f32 %v2712_v35, %v1149_v10  ;;  %v1403_v11 = vmul.f32 %v3493_v18, %v1378_v32  ;;  %v3505_v32 = vld [vmem:[#allocation16_spill] sm:$0xff] }
 0x1f6   :  { %v1406_v38 = vmul.f32 %v3501_v12, %v1381_v39 }
 0x1f7   :  { %v1181_v8 = vmul.f32 %v3482_v1, %v1156_v0  ;;  %v1182_v7 = vmul.f32 %v3483_v16, %v1157_v25  ;;  %v1146_v6 = vpop.permute.xlu1 %1145  ;;  %v3491_v0 = vrot.slane %v2760_v56, %v1935_v28 }
 0x1f8   :  { %v1148_v9 = vsel %vm1147_vm13, %v2907_v5, %v1146_v6  ;;  %v1151_v13 = vsel %vm1147_vm13, %v1146_v6, %v1140_v17  ;;  %v3485_v17 = vrot.slane %v2867_v4, %v1935_v28  ;;  %v3490_v4 = vrot.slane %v2760_v56, %v1917_v24 }
 0x1f9   :  { %v1185_v30 = vadd.f32 %v1181_v8, %v1135_v37  ;;  %v1186_v45 = vadd.f32 %v1182_v7, %v1136_v59  ;;  %v1158_v40 = vmul.f32 %v2712_v35, %v1148_v9  ;;  %v1159_v57 = vmul.f32 %v2712_v35, %v1151_v13  ;;  %v3486_v35 = vld [vmem:[#allocation17_spill] sm:$0xff]  ;;  %v3502_v9 = vld [vmem:[#allocation14_spill] sm:$0xff] }
 0x1fa   :  { %v1380_v34 = vmul.f32 %v1376_v63, %v3486_v35  ;;  %v1294_v33 = vmul.f32 %v3490_v4, %v3062_v47  ;;  %v1295_v25 = vmul.f32 %v3491_v0, %v3065_v3  ;;  %v3496_v47 = vld [vmem:[#allocation12_spill] sm:$0xff]  ;;  %v3497_v3 = vld [vmem:[#allocation33_spill] sm:$0xff] }
 0x1fb   :  { %v1222_v54 = vadd.f32 %v2953_v46, %v1185_v30  ;;  %v1223_v44 = vadd.f32 %v2967_v41, %v1186_v45  ;;  %v1183_v5 = vmul.f32 %v3484_v27, %v1158_v40  ;;  %v1184_v48 = vmul.f32 %v3485_v17, %v1159_v57  ;;  %v1302_v51 = vpop.permute.xlu1 %1301  ;;  %v3503_v30 = vld [vmem:[#allocation13_spill] sm:$0xff]  ;;  %v3504_v40 = vld [vmem:[#allocation15_spill] sm:$0xff]  ;;  %v3508_v17 = vld [vmem:[#allocation34_spill] sm:$0xff] }
 0x1fc   :  { %v1304_v60 = vmul.f32 %v1302_v51, %v3488_v26  ;;  %v1305_v10 = vmul.f32 %v1302_v51, %v3489_v22  ;;  %v1306_v63 = vmul.f32 %v1302_v51, %v3495_v29  ;;  %v1307_v37 = vmul.f32 %v1302_v51, %v3496_v47 }
 0x1fd   :  { %v1259_v46 = vadd.f32 %v3010_v14, %v1222_v54  ;;  %v1260_v41 = vadd.f32 %v3015_v2, %v1223_v44  ;;  %v1187_v58 = vadd.f32 %v1183_v5, %v1137_v61  ;;  %v1188_v62 = vadd.f32 %v1184_v48, %v1138_v49 }
 0x1fe   :  { %v3494_v14 = vrot.slane %v3492_v31, %v1906_v19  ;;  %v3498_v1 = vrot.slane %v3497_v3, %v1909_v21  ;;  %v3499_v16 = vrot.slane %v3497_v3, %v1906_v19  ;;  %v3506_v54 = vrot.slane %v3497_v3, %v1917_v24 }
 0x1ff   :  { %v1224_v43 = vadd.f32 %v2988_v23, %v1187_v58  ;;  %v1225_v20 = vadd.f32 %v2993_v50, %v1188_v62  ;;  %v1297_v59 = vadd.f32 %v3077_v53, %v1260_v41  ;;  %v1296_v56 = vadd.f32 %v3072_v36, %v1259_v46  ;;  %v3513_v62 = vld [vmem:[#allocation20_spill] sm:$0xff] }
 0x200   :  { %v1404_v2 = vmul.f32 %v3494_v14, %v1379_v55  ;;  %v1329_v8 = vmul.f32 %v3498_v1, %v1304_v60  ;;  %v1330_v7 = vmul.f32 %v3499_v16, %v1305_v10  ;;  %v1339_v6 = vpop.permute.xlu1 %1338  ;;  %v3500_v23 = vrot.slane %v3492_v31, %v1917_v24  ;;  %v3515_v14 = vld [vmem:[#allocation21_spill] sm:$0xff] }
 0x201   :  { %v1261_v53 = vadd.f32 %v3036_v42, %v1224_v43  ;;  %v1262_v36 = vadd.f32 %v3041_v52, %v1225_v20  ;;  %v1341_v13 = vmul.f32 %v1339_v6, %v3502_v9  ;;  %v1342_v45 = vmul.f32 %v1339_v6, %v3503_v30  ;;  %v3516_v20 = vld [vmem:[#allocation22_spill] sm:$0xff] }
 0x202   :  { %v1405_v50 = vmul.f32 %v3500_v23, %v1380_v34  ;;  %v1343_v57 = vmul.f32 %v1339_v6, %v3504_v40  ;;  %v1344_v55 = vmul.f32 %v1339_v6, %v3505_v32  ;;  %v1331_v44 = vmul.f32 %v3506_v54, %v1306_v63 }
 0x203   :  { %v1298_v61 = vadd.f32 %v1294_v33, %v1261_v53  ;;  %v1299_v49 = vadd.f32 %v1295_v25, %v1262_v36  ;;  %v3507_v27 = vrot.slane %v3497_v3, %v1935_v28  ;;  %v1333_v5 = vadd.f32 %v1329_v8, %v1296_v56  ;;  %v3514_v33 = vld [vmem:[#allocation19_spill] sm:$0xff]  ;;  %v1487_v25 = vpop.permute.xlu0 %1486 }
 0x204   :  { %v1334_v52 = vadd.f32 %v1330_v7, %v1297_v59  ;;  %v3509_v48 = vrot.slane %v3508_v17, %v1909_v21  ;;  %v3510_v35 = vrot.slane %v3508_v17, %v1906_v19  ;;  %v3511_v26 = vrot.slane %v3508_v17, %v1917_v24  ;;  %v3523_v53 = vld [vmem:[#allocation27_spill] sm:$0xff] }
 0x205   :  { %v1332_v42 = vmul.f32 %v3507_v27, %v1307_v37  ;;  %v1335_v15 = vadd.f32 %v1331_v44, %v1298_v61  ;;  %v3512_v22 = vrot.slane %v3508_v17, %v1935_v28  ;;  %v1413_v46 = vpop.permute.xlu1 %1412  ;;  %v3517_v37 = vld [vmem:[#allocation2_spill] sm:$0xff]  ;;  %v1490_v36 = vmul.f32 %v1487_v25, %v3523_v53  ;;  %v3528_v44 = vld [vmem:[#allocation25_spill] sm:$0xff] }
 0x206   :  { %v1366_v51 = vmul.f32 %v3509_v48, %v1341_v13  ;;  %v1367_v34 = vmul.f32 %v3510_v35, %v1342_v45  ;;  %v1368_v60 = vmul.f32 %v3511_v26, %v1343_v57  ;;  %v1415_v4 = vmul.f32 %v1413_v46, %v3513_v62  ;;  %v3524_v57 = vld [vmem:[#allocation24_spill] sm:$0xff] }
 0x207   :  { %v1336_v39 = vadd.f32 %v1332_v42, %v1299_v49  ;;  %v1369_v10 = vmul.f32 %v3512_v22, %v1344_v55  ;;  %v1416_v0 = vmul.f32 %v1413_v46, %v3514_v33  ;;  %v1417_v43 = vmul.f32 %v1413_v46, %v3515_v14  ;;  %v3526_v55 = vld [vmem:[#allocation29_spill] sm:$0xff]  ;;  %v3527_v49 = vld [vmem:[#allocation30_spill] sm:$0xff] }
 0x208   :  { %v1370_v41 = vadd.f32 %v1366_v51, %v1333_v5  ;;  %v1371_v58 = vadd.f32 %v1367_v34, %v1334_v52  ;;  %v1372_v31 = vadd.f32 %v1368_v60, %v1335_v15  ;;  %v1418_v29 = vmul.f32 %v1413_v46, %v3516_v20  ;;  %v3529_v42 = vld [vmem:[#allocation26_spill] sm:$0xff]  ;;  %v3530_v52 = vld [vmem:[#allocation4_spill] sm:$0xff] }
 0x209   :  { %v1373_v18 = vadd.f32 %v1369_v10, %v1336_v39  ;;  %v3518_v59 = vrot.slane %v3517_v37, %v1909_v21  ;;  %v3519_v3 = vrot.slane %v3517_v37, %v1906_v19  ;;  %v3520_v7 = vrot.slane %v3517_v37, %v1917_v24  ;;  %v3535_v60 = vld [vmem:[#allocation32_spill] sm:$0xff] }
 0x20a   :  { %v1408_v63 = vadd.f32 %v1404_v2, %v1371_v58  ;;  %v1407_v47 = vadd.f32 %v1403_v11, %v1370_v41  ;;  %v1409_v8 = vadd.f32 %v1405_v50, %v1372_v31  ;;  %v3521_v23 = vrot.slane %v3517_v37, %v1935_v28  ;;  %v3522_v2 = vld [vmem:[#allocation28_spill] sm:$0xff]  ;;  %v1450_v30 = vpop.permute.xlu1 %1449 }
 0x20b   :  { %v1440_v56 = vmul.f32 %v3518_v59, %v1415_v4  ;;  %v1441_v1 = vmul.f32 %v3519_v3, %v1416_v0  ;;  %v1410_v16 = vadd.f32 %v1406_v38, %v1373_v18  ;;  %v1442_v6 = vmul.f32 %v3520_v7, %v1417_v43  ;;  %v3525_v38 = vld [vmem:[#allocation23_spill] sm:$0xff] }
 0x20c   :  { %v1443_v12 = vmul.f32 %v3521_v23, %v1418_v29  ;;  %v1489_v11 = vmul.f32 %v1487_v25, %v3522_v2  ;;  %v1452_v50 = vmul.f32 %v1450_v30, %v3524_v57  ;;  %v1453_v32 = vmul.f32 %v1450_v30, %v3525_v38 }
 0x20d   :  { %v1444_v9 = vadd.f32 %v1440_v56, %v1407_v47  ;;  %v1445_v13 = vadd.f32 %v1441_v1, %v1408_v63  ;;  %v1446_v45 = vadd.f32 %v1442_v6, %v1409_v8  ;;  %v1491_v61 = vmul.f32 %v1487_v25, %v3526_v55  ;;  %v1560_v1 = vpop.permute.xlu0 %1559 }
 0x20e   :  { %v1447_v40 = vadd.f32 %v1443_v12, %v1410_v16  ;;  %v1492_v54 = vmul.f32 %v1487_v25, %v3527_v49  ;;  %v1454_v27 = vmul.f32 %v1450_v30, %v3528_v44  ;;  %v1455_v5 = vmul.f32 %v1450_v30, %v3529_v42 }
 0x20f   :  { %v3531_v17 = vrot.slane %v3530_v52, %v1909_v21  ;;  %v3532_v51 = vrot.slane %v3530_v52, %v1906_v19  ;;  %v3533_v34 = vrot.slane %v3530_v52, %v1917_v24  ;;  %v3534_v39 = vrot.slane %v3530_v52, %v1935_v28  ;;  %v1525_v62 = vpop.permute.xlu1 %1524 }
 0x210   :  { %v3536_v22 = vrot.slane %v3535_v60, %v1909_v21  ;;  %v3537_v46 = vrot.slane %v3535_v60, %v1906_v19  ;;  %v3538_v33 = vrot.slane %v3535_v60, %v1917_v24  ;;  %v3539_v25 = vrot.slane %v3535_v60, %v1935_v28 }
 0x211   :  { %v1477_v48 = vmul.f32 %v3531_v17, %v1452_v50  ;;  %v1478_v35 = vmul.f32 %v3532_v51, %v1453_v32  ;;  %v1479_v15 = vmul.f32 %v3533_v34, %v1454_v27  ;;  %v1480_v26 = vmul.f32 %v3534_v39, %v1455_v5 }
 0x212   :  { %v1514_v10 = vmul.f32 %v3536_v22, %v1489_v11  ;;  %v1515_v41 = vmul.f32 %v3537_v46, %v1490_v36  ;;  %v1516_v0 = vmul.f32 %v3538_v33, %v1491_v61  ;;  %v1517_v31 = vmul.f32 %v3539_v25, %v1492_v54 }
 0x213   :  { %v1482_v58 = vadd.f32 %v1478_v35, %v1445_v13  ;;  %v1481_v4 = vadd.f32 %v1477_v48, %v1444_v9  ;;  %v1483_v18 = vadd.f32 %v1479_v15, %v1446_v45  ;;  %v1484_v14 = vadd.f32 %v1480_v26, %v1447_v40  ;;  %v1536_v59 = vpop.permute.xlu1 %1535 }
 0x215   :  { %v1519_v43 = vadd.f32 %v1515_v41, %v1482_v58  ;;  %v1518_v20 = vadd.f32 %v1514_v10, %v1481_v4  ;;  %v1520_v29 = vadd.f32 %v1516_v0, %v1483_v18  ;;  %v1521_v63 = vadd.f32 %v1517_v31, %v1484_v14 }
 0x217   :  { %v1527_v47 = vadd.f32 %v1525_v62, %v1518_v20  ;;  %v1528_v37 = vadd.f32 %v1525_v62, %v1519_v43  ;;  %v1529_v56 = vadd.f32 %v1525_v62, %v1520_v29  ;;  %v1530_v3 = vadd.f32 %v1525_v62, %v1521_v63 }
 0x218   :  { %v1588_v50 = vpop.permute.xlu1 %1587 }
 0x219   :  { %v1545_v8 = vrot.slane %v1528_v37, %v1909_v21  ;;  %v1541_v16 = vrot.slane %v1527_v47, %v1909_v21  ;;  %v1565_v7 = vrot.slane %v1527_v47, %v1906_v19  ;;  %v1569_v6 = vrot.slane %v1528_v37, %v1906_v19 }
 0x21a   :  { %v1549_v23 = vrot.slane %v1529_v56, %v1909_v21  ;;  %v1553_v12 = vrot.slane %v1530_v3, %v1909_v21  ;;  %v1573_v2 = vrot.slane %v1529_v56, %v1906_v19  ;;  %v1577_v11 = vrot.slane %v1530_v3, %v1906_v19 }
 0x21b   :  { %v1554_v53 = vmul.f32 %v1541_v16, %v1536_v59  ;;  %v1555_v36 = vmul.f32 %v1545_v8, %v1536_v59  ;;  %v1578_v9 = vmul.f32 %v1565_v7, %v1560_v1  ;;  %v1579_v13 = vmul.f32 %v1569_v6, %v1560_v1 }
 0x21c   :  { %v1556_v30 = vmul.f32 %v1549_v23, %v1536_v59  ;;  %v1557_v45 = vmul.f32 %v1553_v12, %v1536_v59  ;;  %v1580_v40 = vmul.f32 %v1573_v2, %v1560_v1  ;;  %v1581_v57 = vmul.f32 %v1577_v11, %v1560_v1 }
 0x21d   :  { %v1582_v38 = vadd.f32 %v1578_v9, %v1554_v53  ;;  %v1583_v32 = vadd.f32 %v1579_v13, %v1555_v36  ;;  %v1597_v55 = vrot.slane %v1528_v37, %v1917_v24  ;;  %v1601_v61 = vrot.slane %v1529_v56, %v1917_v24  ;;  %v1616_v35 = vpop.permute.xlu1 %1615 }
 0x21e   :  { %v1584_v21 = vadd.f32 %v1580_v40, %v1556_v30  ;;  %v1585_v49 = vadd.f32 %v1581_v57, %v1557_v45  ;;  %v1605_v54 = vrot.slane %v1530_v3, %v1917_v24  ;;  %v1593_v19 = vrot.slane %v1527_v47, %v1917_v24  ;;  %v1645_v24 = vpop.permute.xlu0 %1644 }
 0x21f   :  { %v1607_v44 = vmul.f32 %v1597_v55, %v1588_v50  ;;  %v1608_v27 = vmul.f32 %v1601_v61, %v1588_v50  ;;  %v1625_v42 = vrot.slane %v1528_v37, %v1935_v28  ;;  %v1629_v5 = vrot.slane %v1529_v56, %v1935_v28 }
 0x220   :  { %v1606_v52 = vmul.f32 %v1593_v19, %v1588_v50  ;;  %v1609_v17 = vmul.f32 %v1605_v54, %v1588_v50  ;;  %v1633_v48 = vrot.slane %v1530_v3, %v1935_v28  ;;  %v1621_v51 = vrot.slane %v1527_v47, %v1935_v28 }
 0x221   :  { %v1611_v34 = vadd.f32 %v1607_v44, %v1583_v32  ;;  %v1612_v15 = vadd.f32 %v1608_v27, %v1584_v21  ;;  %v1635_v26 = vmul.f32 %v1625_v42, %v1616_v35  ;;  %v1636_v60 = vmul.f32 %v1629_v5, %v1616_v35 }
 0x222   :  { %v1634_v39 = vmul.f32 %v1621_v51, %v1616_v35  ;;  %v1637_v22 = vmul.f32 %v1633_v48, %v1616_v35  ;;  %v1610_v10 = vadd.f32 %v1606_v52, %v1582_v38  ;;  %v1613_v46 = vadd.f32 %v1609_v17, %v1585_v49 }
 0x223   :  { %v1639_v41 = vadd.f32 %v1635_v26, %v1611_v34  ;;  %v1640_v58 = vadd.f32 %v1636_v60, %v1612_v15 }
 0x224   :  { %v1638_v62 = vadd.f32 %v1634_v39, %v1610_v10  ;;  %v1641_v4 = vadd.f32 %v1637_v22, %v1613_v46 }
 0x225   :  { %v1648_v33 = vadd.f32 %v1645_v24, %v1639_v41  ;;  %v1649_v0 = vadd.f32 %v1645_v24, %v1640_v58 }
 0x226   :  { %v1647_v25 = vadd.f32 %v1645_v24, %v1638_v62  ;;  %v1650_v31 = vadd.f32 %v1645_v24, %v1641_v4 }
 0x227   :  { %v1652_v18 = vmax.f32 %v1648_v33, 0.0  ;;  %v1653_v28 = vmax.f32 %v1649_v0, 0.0 }
 0x228   :  { %v1651_v14 = vmax.f32 %v1647_v25, 0.0  ;;  %v1654_v43 = vmax.f32 %v1650_v31, 0.0 }
 0x22a   :  { %v1659_v20 = vcombine.low %v1651_v14, %v1652_v18  ;;  %v1660_v29 = vcombine.low %v1653_v28, %v1654_v43 }
 0x22c   :  { %1663 = vst [vmem:[%s3348_s8 + $0x10] sm:$0xff] %v1659_v20  ;;  %1664 = vst [vmem:[%s3348_s8 + $0x18] sm:$0xff] %v1660_v29 }

</bundles_post_ra>
